<compile_context>
chip_gen: v5e
topology: v5e:2x2
jax: 0.10.0
libtpu: 0.0.40
codegen_flags: <defaults>
</compile_context>

<pallas_src>
import functools

import jax
import jax.numpy as jnp
from jax import lax
from jax.experimental import pallas as pl
from jax.experimental.pallas import tpu as pltpu


_VMEM_LIMIT = 48 * 1024 * 1024
_SLOPE = 0.2          # LeakyReLU negative slope
_EPS = 1e-5           # BatchNorm eps


def _round_up(v, m):
    return (v + m - 1) // m * m


# ----------------------------------------------------------------------------
# Pallas kernels
# ----------------------------------------------------------------------------
def _conv_plane_kernel(a0_ref, a1_ref, w_ref, b_ref, *outs,
                       shifts, tm, act, stats_cfg):
    """Shifted-row direct convolution over a flattened NHWC plane.

    a0_ref : (tm, Cin)   bf16 rows of this output block
    a1_ref : (halo, Cin) bf16 halo rows immediately after them
    w_ref  : (taps, Cin, Cp) bf16 per-tap weights
    b_ref  : (1, Cp) f32 bias
    outs   : o_ref (tm, Cp) bf16 [, sum_ref (8,Cp) f32, sq_ref (8,Cp) f32], acc scratch
    """
    if stats_cfg is None:
        o_ref, acc_ref = outs
        sum_ref = sq_ref = None
    else:
        o_ref, sum_ref, sq_ref, acc_ref = outs

    # (tm + halo, Cin) window of the flattened input.
    window = jnp.concatenate([a0_ref[...], a1_ref[...]], axis=0)

    # Tap 0 has shift 0 -> use the A block directly (no sliced copy, no zero fill).
    acc_ref[...] = jnp.dot(a0_ref[...], w_ref[0],
                           preferred_element_type=jnp.float32)
    for t in range(1, len(shifts)):                     # static unroll, <=16 taps
        s = shifts[t]
        acc_ref[...] += jnp.dot(window[s:s + tm, :], w_ref[t],
                                preferred_element_type=jnp.float32)

    y = acc_ref[...] + b_ref[...]                       # f32 epilogue
    if act:                                             # fused LeakyReLU (no-BN layer)
        y = jnp.where(y > 0, y, _SLOPE * y)
    o_ref[...] = y.astype(o_ref.dtype)

    if stats_cfg is not None:
        # Masked per-channel sum / sumsq over *valid* output rows only
        # (padding / wrap-around rows of the full plane are excluded).
        wp, ho, wo, plane_sz, valid_rows = stats_cfg
        r = pl.program_id(0) * tm + lax.broadcasted_iota(jnp.int32, (tm, 1), 0)
        rem = r % plane_sz
        valid = (r < valid_rows) & ((rem // wp) < ho) & ((rem % wp) < wo)
        ym = jnp.where(valid, y, 0.0)
        row0 = (lax.broadcasted_iota(jnp.int32, (8, 1), 0) == 0).astype(jnp.float32)
        sum_ref[...] = row0 * jnp.sum(ym, axis=0, keepdims=True)
        sq_ref[...] = row0 * jnp.sum(ym * ym, axis=0, keepdims=True)


def _bn_act_kernel(x_ref, scale_ref, shift_ref, o_ref):
    """y = x * scale + shift (folded BatchNorm) then LeakyReLU(0.2); f32 math."""
    y = x_ref[...].astype(jnp.float32) * scale_ref[...] + shift_ref[...]
    o_ref[...] = jnp.where(y > 0, y, _SLOPE * y).astype(o_ref.dtype)


# ----------------------------------------------------------------------------
# Tiling / layout helpers (JAX glue, no HBM blow-up)
# ----------------------------------------------------------------------------
def _row_tiling(rows, max_shift):
    """Pick (row tile, halo): halo = next_pow2(max_shift) >= 8 so it divides any
    power-of-two tile; prefer the largest tile that still yields >=2 row blocks
    (v7x megacore), otherwise the smallest candidate."""
    halo = max(8, pl.next_power_of_2(max_shift))
    cands = [t for t in (1024, 512, 256, 128) if t >= halo]
    if not cands:
        return halo, halo
    for t in cands:                       # descending
        if pl.cdiv(rows, t) >= 2:
            return t, halo
    return cands[-1], halo


def _make_plane(x, stride):
    """Spatially pad (and space-to-depth for stride 2) an NHWC activation.

    Returns (plane (N,Hp,Wp,C'), (kh,kw) of the equivalent stride-1 conv,
    (Ho,Wo) of the PyTorch conv output)."""
    n, h, w_, c = x.shape
    ho = (h + 2 - 4) // stride + 1
    wo = (w_ + 2 - 4) // stride + 1
    xp = jnp.pad(x, ((0, 0), (1, 1), (1, 1), (0, 0)))
    if stride == 1:
        return xp, (4, 4), (ho, wo)
    # stride 2: 4x4/s2 conv == 2x2/s1 conv on the space-to-depth input (no expansion)
    hp, wp = xp.shape[1], xp.shape[2]
    xp = jnp.pad(xp, ((0, 0), (0, hp % 2), (0, wp % 2), (0, 0)))
    h2, w2 = xp.shape[1] // 2, xp.shape[2] // 2
    z = xp.reshape(n, h2, 2, w2, 2, c).transpose(0, 1, 3, 2, 4, 5)
    return z.reshape(n, h2, w2, 4 * c), (2, 2), (ho, wo)


def _prep_w_stride1(w, cin_p, cp):
    """OIHW (Cout,Cin,4,4) -> (16, Cin_p, Cp) bf16, tap order t = i*4 + j."""
    cout, cin, kh, kw = w.shape
    wt = jnp.transpose(w, (2, 3, 1, 0)).reshape(kh * kw, cin, cout)
    wt = jnp.pad(wt, ((0, 0), (0, cin_p - cin), (0, cp - cout)))
    return wt.astype(jnp.bfloat16)


def _prep_w_s2d(w, cin_p, cp):
    """OIHW 4x4 stride-2 weights -> equivalent 2x2 stride-1 weights on the
    space-to-depth input: (4, 4*Cin -> Cin_p, Cp) bf16, tap order t = a*2 + b."""
    cout, cin, _, _ = w.shape
    wt = jnp.transpose(w, (2, 3, 1, 0))                 # (i, j, ci, co)
    wt = wt.reshape(2, 2, 2, 2, cin, cout)              # (a, i0, b, j0, ci, co)
    wt = jnp.transpose(wt, (0, 2, 1, 3, 4, 5))          # (a, b, i0, j0, ci, co)
    wt = wt.reshape(4, 4 * cin, cout)
    wt = jnp.pad(wt, ((0, 0), (0, cin_p - 4 * cin), (0, cp - cout)))
    return wt.astype(jnp.bfloat16)


# ----------------------------------------------------------------------------
# Layer wrappers
# ----------------------------------------------------------------------------
def conv2d_plane(x, w, b, stride, *, act, want_stats):
    """PyTorch Conv2d(k=4, pad=1, stride in {1,2}) on an NHWC bf16 activation.
    Returns (y (N,Ho,Wo,Cp) bf16 with Cp = round_up(Cout,128) lane-dense channels,
    optional (sum, sumsq, count) BN stats over the true Cout channels)."""
    n = x.shape[0]
    cout = w.shape[0]
    cp = _round_up(cout, 128)                           # lane-dense output channels

    plane, (kh, kw), (ho, wo) = _make_plane(x, stride)
    _, hp, wp, cin = plane.shape
    cin_p = _round_up(cin, 8)
    if cin_p != cin:
        plane = jnp.pad(plane, ((0, 0), (0, 0), (0, 0), (0, cin_p - cin)))

    wstack = _prep_w_stride1(w, cin_p, cp) if stride == 1 else _prep_w_s2d(w, cin_p, cp)
    bias = jnp.pad(b, (0, cp - cout)).reshape(1, cp).astype(jnp.float32)

    shifts = tuple(i * wp + j for i in range(kh) for j in range(kw))
    rows = n * hp * wp
    tm, halo = _row_tiling(rows, shifts[-1])
    nb = pl.cdiv(rows, tm)
    q = tm // halo

    x2d = plane.reshape(rows, cin_p).astype(jnp.bfloat16)
    x2d = jnp.pad(x2d, ((0, nb * tm + halo - rows), (0, 0)))

    kern = functools.partial(
        _conv_plane_kernel, shifts=shifts, tm=tm, act=act,
        stats_cfg=(wp, ho, wo, hp * wp, rows) if want_stats else None)

    if want_stats:
        out_shape = (
            jax.ShapeDtypeStruct((nb * tm, cp), jnp.bfloat16),
            jax.ShapeDtypeStruct((nb * 8, cp), jnp.float32),
            jax.ShapeDtypeStruct((nb * 8, cp), jnp.float32),
        )
        out_specs = (
            pl.BlockSpec((tm, cp), lambda i: (i, 0)),
            pl.BlockSpec((8, cp), lambda i: (i, 0)),
            pl.BlockSpec((8, cp), lambda i: (i, 0)),
        )
    else:
        out_shape = jax.ShapeDtypeStruct((nb * tm, cp), jnp.bfloat16)
        out_specs = pl.BlockSpec((tm, cp), lambda i: (i, 0))

    res = pl.pallas_call(
        kern,
        out_shape=out_shape,
        grid=(nb,),
        in_specs=[
            pl.BlockSpec((tm, cin_p), lambda i: (i, 0)),              # block rows
            pl.BlockSpec((halo, cin_p), lambda i: ((i + 1) * q, 0)),  # halo rows
            pl.BlockSpec((kh * kw, cin_p, cp), lambda i: (0, 0, 0)),  # weights
            pl.BlockSpec((1, cp), lambda i: (0, 0)),                  # bias
        ],
        out_specs=out_specs,
        scratch_shapes=[pltpu.VMEM((tm, cp), jnp.float32)],
        compiler_params=pltpu.CompilerParams(
            dimension_semantics=("parallel",),
            vmem_limit_bytes=_VMEM_LIMIT),
    )(x2d, x2d, wstack, bias)

    if want_stats:
        out2d, psum, psq = res
    else:
        out2d, psum, psq = res, None, None

    # Keep the lane-dense Cp channels; only the plane padding rows are dropped.
    y = out2d[:rows].reshape(n, hp, wp, cp)[:, :ho, :wo, :]
    if not want_stats:
        return y, None
    ssum = jnp.sum(psum, axis=0)[:cout]
    ssq = jnp.sum(psq, axis=0)[:cout]
    count = jnp.float32(n * ho * wo)
    return y, (ssum, ssq, count)


def bn_act(x2d, scale, shift):
    """Folded BatchNorm affine + LeakyReLU over a (V, Cp) bf16 activation,
    lane-dense in Cp (padded channels carry zeros and stay zero)."""
    v, c = x2d.shape
    cands = [t for t in (1024, 512, 256, 128) if pl.cdiv(v, t) >= 2]
    tv = cands[0] if cands else min(128, _round_up(v, 8))
    vp = _round_up(v, tv)
    if vp != v:
        x2d = jnp.pad(x2d, ((0, vp - v), (0, 0)))
    out = pl.pallas_call(
        _bn_act_kernel,
        out_shape=jax.ShapeDtypeStruct((vp, c), jnp.bfloat16),
        grid=(vp // tv,),
        in_specs=[
            pl.BlockSpec((tv, c), lambda i: (i, 0)),
            pl.BlockSpec((1, c), lambda i: (0, 0)),
            pl.BlockSpec((1, c), lambda i: (0, 0)),
        ],
        out_specs=pl.BlockSpec((tv, c), lambda i: (i, 0)),
        compiler_params=pltpu.CompilerParams(
            dimension_semantics=("parallel",),
            vmem_limit_bytes=_VMEM_LIMIT),
    )(x2d, scale, shift)
    return out[:v]


# ----------------------------------------------------------------------------
# PatchDis model
# ----------------------------------------------------------------------------
def init_patchdis_params(key, input_nc, ndf=64, n_layers=3):
    """Deterministic synthetic init matching PatchDis.__init__ shapes (f32)."""
    params = []
    kw_ = 4

    def conv_p(key, cin, cout):
        k1, k2 = jax.random.split(key)
        w = 0.05 * jax.random.normal(k1, (cout, cin, kw_, kw_), jnp.float32)
        b = 0.05 * jax.random.normal(k2, (cout,), jnp.float32)
        return w, b

    def bn_p(key, c):
        k1, k2 = jax.random.split(key)
        g = 1.0 + 0.1 * jax.random.normal(k1, (c,), jnp.float32)
        bt = 0.1 * jax.random.normal(k2, (c,), jnp.float32)
        return g, bt

    keys = jax.random.split(key, 16)
    ki = 0

    # layer 0: conv(input_nc -> ndf), stride 2, LeakyReLU (no BN)
    w, b = conv_p(keys[ki], input_nc, ndf); ki += 1
    params.append(dict(w=w, b=b, stride=2, bn=None))

    nf_mult = 1
    for n in range(1, n_layers):
        nf_prev, nf_mult = nf_mult, min(2 ** n, 8)
        w, b = conv_p(keys[ki], ndf * nf_prev, ndf * nf_mult); ki += 1
        g, bt = bn_p(keys[ki], ndf * nf_mult); ki += 1
        params.append(dict(w=w, b=b, stride=2, bn=(g, bt)))

    nf_prev, nf_mult = nf_mult, min(2 ** n_layers, 8)
    w, b = conv_p(keys[ki], ndf * nf_prev, ndf * nf_mult); ki += 1
    g, bt = bn_p(keys[ki], ndf * nf_mult); ki += 1
    params.append(dict(w=w, b=b, stride=1, bn=(g, bt)))

    # final conv -> 1 channel, no norm, no activation
    w, b = conv_p(keys[ki], ndf * nf_mult, 1); ki += 1
    params.append(dict(w=w, b=b, stride=1, bn="final"))

    return params


def patchdis_forward(x, params):
    """NCHW f32 in / NCHW f32 out; NHWC bf16 internally, one transpose each way."""
    h = jnp.transpose(x, (0, 2, 3, 1)).astype(jnp.bfloat16)
    for layer in params:
        bn = layer["bn"]
        cout = layer["w"].shape[0]
        is_bn = isinstance(bn, tuple)
        y, stats = conv2d_plane(h, layer["w"], layer["b"], layer["stride"],
                                act=(bn is None), want_stats=is_bn)
        n_, ho_, wo_, cp_ = y.shape
        if is_bn:
            gamma, beta = bn
            ssum, ssq, count = stats
            mean = ssum / count
            # TODO(synk): single-pass E[x^2]-E[x]^2 variance (f32) can cancel for
            # large-mean activations; a two-pass/shifted formulation would be safer.
            var = jnp.maximum(ssq / count - mean * mean, 0.0)
            inv_std = gamma / jnp.sqrt(var + _EPS)
            scale = jnp.pad(inv_std, (0, cp_ - cout)).reshape(1, cp_).astype(jnp.float32)
            shift = jnp.pad(beta - mean * inv_std,
                            (0, cp_ - cout)).reshape(1, cp_).astype(jnp.float32)
            y = bn_act(y.reshape(n_ * ho_ * wo_, cp_), scale, shift)
            y = y.reshape(n_, ho_, wo_, cp_)
        # Slice back to the true channel count so the next conv's MXU work does
        # not grow from zero-padded channels (no-op when Cout is already 128k).
        h = y[..., :cout] if cp_ != cout else y
    return jnp.transpose(h, (0, 3, 1, 2)).astype(jnp.float32)


# ----------------------------------------------------------------------------
# Pure-JAX f32 reference (sanity check of the Pallas path)
# ----------------------------------------------------------------------------
def patchdis_forward_ref(x, params):
    def conv(x, w, b, s):
        y = lax.conv_general_dilated(
            x, w, (s, s), [(1, 1), (1, 1)],
            dimension_numbers=("NCHW", "OIHW", "NCHW"))
        return y + b.reshape(1, -1, 1, 1)

    def lrelu(v):
        return jnp.where(v > 0, v, _SLOPE * v)

    def bn(v, g, bt, eps=_EPS):
        m = v.mean(axis=(0, 2, 3), keepdims=True)
        var = ((v - m) ** 2).mean(axis=(0, 2, 3), keepdims=True)
        return (v - m) / jnp.sqrt(var + eps) * g.reshape(1, -1, 1, 1) + bt.reshape(1, -1, 1, 1)

    h = x
    for layer in params:
        which = layer["bn"]
        h = conv(h, layer["w"], layer["b"], layer["stride"])
        if which is None:
            h = lrelu(h)
        elif which == "final":
            pass
        else:
            h = lrelu(bn(h, which[0], which[1]))
    return h


# ----------------------------------------------------------------------------
if __name__ == "__main__":
    key = jax.random.PRNGKey(0)
    k_x, k_p = jax.random.split(key)

    # 32x32 input survives the 5-conv stack (output spatial 2x2)
    input_nc, ndf, n_layers = 4, 16, 3
    x = jax.random.normal(k_x, (2, input_nc, 32, 32), jnp.float32)

    params = init_patchdis_params(k_p, input_nc, ndf=ndf, n_layers=n_layers)

    out = jax.block_until_ready(patchdis_forward(x, params))
    ref = jax.block_until_ready(patchdis_forward_ref(x, params))

    assert out.shape == ref.shape, (out.shape, ref.shape)
    max_diff = float(jnp.max(jnp.abs(out - ref)))
    ref_scale = float(jnp.max(jnp.abs(ref)))
    # bf16 activations/weights through a 5-layer stack: allow ~5% of output scale.
    tol = 5e-2 * ref_scale + 5e-2
    assert max_diff < tol, f"mismatch vs reference: {max_diff} (tol {tol})"

    print("KERNEL_OK")
</pallas_src>

<mosaic_0001>
module attributes {stable_mosaic.version = 11 : i64} {
  func.func @_conv_plane_kernel(%arg0: i32, %arg1: memref<512x16xbf16, #tpu.memory_space<vmem>>, %arg2: memref<32x16xbf16, #tpu.memory_space<vmem>>, %arg3: memref<4x16x128xbf16, #tpu.memory_space<vmem>>, %arg4: memref<1x128xf32, #tpu.memory_space<vmem>>, %arg5: memref<512x128xbf16, #tpu.memory_space<vmem>>, %arg6: memref<512x128xf32, #tpu.memory_space<vmem>>) attributes {dimension_semantics = [#tpu.dimension_semantics<parallel>], iteration_bounds = array<i64: 2>, scalar_prefetch = 0 : i64, scratch_operands = 1 : i64, tpu.core_type = #tpu.core_type<tc>, window_params = [{transform_indices = @transform_0, window_bounds = array<i64: 512, 16>}, {transform_indices = @transform_1, window_bounds = array<i64: 32, 16>}, {pipeline_mode = #tpu.pipeline_mode<synchronous>, transform_indices = @transform_2, window_bounds = array<i64: 4, 16, 128>}, {pipeline_mode = #tpu.pipeline_mode<synchronous>, transform_indices = @transform_3, window_bounds = array<i64: 1, 128>}, {transform_indices = @transform_4, window_bounds = array<i64: 512, 128>}]} {
    %c0 = arith.constant 0 : index
    %c0_0 = arith.constant 0 : index
    %0 = vector.load %arg1[%c0, %c0_0] : memref<512x16xbf16, #tpu.memory_space<vmem>>, vector<512x16xbf16>
    %c0_1 = arith.constant 0 : index
    %c0_2 = arith.constant 0 : index
    %1 = vector.load %arg2[%c0_1, %c0_2] : memref<32x16xbf16, #tpu.memory_space<vmem>>, vector<32x16xbf16>
    %2 = tpu.concatenate %0, %1 in 0 : vector<512x16xbf16>, vector<32x16xbf16> -> vector<544x16xbf16>
    %c0_3 = arith.constant 0 : index
    %c0_4 = arith.constant 0 : index
    %3 = vector.load %arg1[%c0_3, %c0_4] : memref<512x16xbf16, #tpu.memory_space<vmem>>, vector<512x16xbf16>
    %c0_5 = arith.constant 0 : index
    %c0_6 = arith.constant 0 : index
    %c0_7 = arith.constant 0 : index
    %4 = vector.load %arg3[%c0_5, %c0_6, %c0_7] : memref<4x16x128xbf16, #tpu.memory_space<vmem>>, vector<1x16x128xbf16>
    %5 = vector.shape_cast %4 : vector<1x16x128xbf16> to vector<16x128xbf16>
    %cst = arith.constant dense<0.000000e+00> : vector<512x128xf32>
    %6 = tpu.matmul %3, %5, %cst {dimension_numbers = #tpu.dot_dimension_numbers<[1], [0], [0], [1], [0, 0, 1, 1], [], []>} : vector<512x16xbf16>, vector<16x128xbf16>, vector<512x128xf32> -> vector<512x128xf32>
    %c0_8 = arith.constant 0 : index
    %c0_9 = arith.constant 0 : index
    %7 = vector.load %arg6[%c0_8, %c0_9] : memref<512x128xf32, #tpu.memory_space<vmem>>, vector<512x128xf32>
    tpu.vector_store %arg6[%c0_8, %c0_9], %6 {strides = array<i32>} : memref<512x128xf32, #tpu.memory_space<vmem>>, vector<512x128xf32>,
    %c0_10 = arith.constant 0 : index
    %c0_11 = arith.constant 0 : index
    %8 = vector.load %arg6[%c0_10, %c0_11] : memref<512x128xf32, #tpu.memory_space<vmem>>, vector<512x128xf32>
    %9 = vector.extract_strided_slice %2 {offsets = [1, 0], sizes = [512, 16], strides = [1, 1]} : vector<544x16xbf16> to vector<512x16xbf16>
    %c1 = arith.constant 1 : index
    %c0_12 = arith.constant 0 : index
    %c0_13 = arith.constant 0 : index
    %10 = vector.load %arg3[%c1, %c0_12, %c0_13] : memref<4x16x128xbf16, #tpu.memory_space<vmem>>, vector<1x16x128xbf16>
    %11 = vector.shape_cast %10 : vector<1x16x128xbf16> to vector<16x128xbf16>
    %cst_14 = arith.constant dense<0.000000e+00> : vector<512x128xf32>
    %12 = tpu.matmul %9, %11, %cst_14 {dimension_numbers = #tpu.dot_dimension_numbers<[1], [0], [0], [1], [0, 0, 1, 1], [], []>} : vector<512x16xbf16>, vector<16x128xbf16>, vector<512x128xf32> -> vector<512x128xf32>
    %13 = arith.addf %8, %12 : vector<512x128xf32>
    %c0_15 = arith.constant 0 : index
    %c0_16 = arith.constant 0 : index
    %14 = vector.load %arg6[%c0_15, %c0_16] : memref<512x128xf32, #tpu.memory_space<vmem>>, vector<512x128xf32>
    tpu.vector_store %arg6[%c0_15, %c0_16], %13 {strides = array<i32>} : memref<512x128xf32, #tpu.memory_space<vmem>>, vector<512x128xf32>,
    %c0_17 = arith.constant 0 : index
    %c0_18 = arith.constant 0 : index
    %15 = vector.load %arg6[%c0_17, %c0_18] : memref<512x128xf32, #tpu.memory_space<vmem>>, vector<512x128xf32>
    %16 = vector.extract_strided_slice %2 {offsets = [17, 0], sizes = [512, 16], strides = [1, 1]} : vector<544x16xbf16> to vector<512x16xbf16>
    %c2 = arith.constant 2 : index
    %c0_19 = arith.constant 0 : index
    %c0_20 = arith.constant 0 : index
    %17 = vector.load %arg3[%c2, %c0_19, %c0_20] : memref<4x16x128xbf16, #tpu.memory_space<vmem>>, vector<1x16x128xbf16>
    %18 = vector.shape_cast %17 : vector<1x16x128xbf16> to vector<16x128xbf16>
    %cst_21 = arith.constant dense<0.000000e+00> : vector<512x128xf32>
    %19 = tpu.matmul %16, %18, %cst_21 {dimension_numbers = #tpu.dot_dimension_numbers<[1], [0], [0], [1], [0, 0, 1, 1], [], []>} : vector<512x16xbf16>, vector<16x128xbf16>, vector<512x128xf32> -> vector<512x128xf32>
    %20 = arith.addf %15, %19 : vector<512x128xf32>
    %c0_22 = arith.constant 0 : index
    %c0_23 = arith.constant 0 : index
    %21 = vector.load %arg6[%c0_22, %c0_23] : memref<512x128xf32, #tpu.memory_space<vmem>>, vector<512x128xf32>
    tpu.vector_store %arg6[%c0_22, %c0_23], %20 {strides = array<i32>} : memref<512x128xf32, #tpu.memory_space<vmem>>, vector<512x128xf32>,
    %c0_24 = arith.constant 0 : index
    %c0_25 = arith.constant 0 : index
    %22 = vector.load %arg6[%c0_24, %c0_25] : memref<512x128xf32, #tpu.memory_space<vmem>>, vector<512x128xf32>
    %23 = vector.extract_strided_slice %2 {offsets = [18, 0], sizes = [512, 16], strides = [1, 1]} : vector<544x16xbf16> to vector<512x16xbf16>
    %c3 = arith.constant 3 : index
    %c0_26 = arith.constant 0 : index
    %c0_27 = arith.constant 0 : index
    %24 = vector.load %arg3[%c3, %c0_26, %c0_27] : memref<4x16x128xbf16, #tpu.memory_space<vmem>>, vector<1x16x128xbf16>
    %25 = vector.shape_cast %24 : vector<1x16x128xbf16> to vector<16x128xbf16>
    %cst_28 = arith.constant dense<0.000000e+00> : vector<512x128xf32>
    %26 = tpu.matmul %23, %25, %cst_28 {dimension_numbers = #tpu.dot_dimension_numbers<[1], [0], [0], [1], [0, 0, 1, 1], [], []>} : vector<512x16xbf16>, vector<16x128xbf16>, vector<512x128xf32> -> vector<512x128xf32>
    %27 = arith.addf %22, %26 : vector<512x128xf32>
    %c0_29 = arith.constant 0 : index
    %c0_30 = arith.constant 0 : index
    %28 = vector.load %arg6[%c0_29, %c0_30] : memref<512x128xf32, #tpu.memory_space<vmem>>, vector<512x128xf32>
    tpu.vector_store %arg6[%c0_29, %c0_30], %27 {strides = array<i32>} : memref<512x128xf32, #tpu.memory_space<vmem>>, vector<512x128xf32>,
    %c0_31 = arith.constant 0 : index
    %c0_32 = arith.constant 0 : index
    %29 = vector.load %arg6[%c0_31, %c0_32] : memref<512x128xf32, #tpu.memory_space<vmem>>, vector<512x128xf32>
    %c0_33 = arith.constant 0 : index
    %c0_34 = arith.constant 0 : index
    %30 = vector.load %arg4[%c0_33, %c0_34] : memref<1x128xf32, #tpu.memory_space<vmem>>, vector<1x128xf32>
    %31 = vector.broadcast %30 : vector<1x128xf32> to vector<512x128xf32>
    %32 = arith.addf %29, %31 : vector<512x128xf32>
    %cst_35 = arith.constant 0.000000e+00 : f32
    %33 = vector.broadcast %cst_35 : f32 to vector<512x128xf32>
    %34 = arith.cmpf ogt, %32, %33 : vector<512x128xf32>
    %cst_36 = arith.constant 2.000000e-01 : f32
    %35 = vector.broadcast %cst_36 : f32 to vector<512x128xf32>
    %36 = arith.mulf %35, %32 : vector<512x128xf32>
    %37 = arith.select %34, %32, %36 : vector<512x128xi1>, vector<512x128xf32>
    %38 = arith.truncf %37 : vector<512x128xf32> to vector<512x128xbf16>
    %c0_37 = arith.constant 0 : index
    %c0_38 = arith.constant 0 : index
    %39 = vector.load %arg5[%c0_37, %c0_38] : memref<512x128xbf16, #tpu.memory_space<vmem>>, vector<512x128xbf16>
    tpu.vector_store %arg5[%c0_37, %c0_38], %38 {strides = array<i32>} : memref<512x128xbf16, #tpu.memory_space<vmem>>, vector<512x128xbf16>,
    return
  }
  func.func @transform_0(%arg0: i32) -> (i32, i32) {
    %c0_i32 = arith.constant 0 : i32
    %c0_i32_0 = arith.constant 0 : i32
    return %arg0, %c0_i32 : i32, i32
  }
  func.func @transform_1(%arg0: i32) -> (i32, i32) {
    %c1_i32 = arith.constant 1 : i32
    %0 = arith.addi %arg0, %c1_i32 : i32
    %c16_i32 = arith.constant 16 : i32
    %1 = arith.muli %0, %c16_i32 : i32
    %c0_i32 = arith.constant 0 : i32
    %c0_i32_0 = arith.constant 0 : i32
    return %1, %c0_i32 : i32, i32
  }
  func.func @transform_2(%arg0: i32) -> (i32, i32, i32) {
    %c0_i32 = arith.constant 0 : i32
    %c0_i32_0 = arith.constant 0 : i32
    %c0_i32_1 = arith.constant 0 : i32
    %c0_i32_2 = arith.constant 0 : i32
    return %c0_i32, %c0_i32_0, %c0_i32_1 : i32, i32, i32
  }
  func.func @transform_3(%arg0: i32) -> (i32, i32) {
    %c0_i32 = arith.constant 0 : i32
    %c0_i32_0 = arith.constant 0 : i32
    %c0_i32_1 = arith.constant 0 : i32
    return %c0_i32, %c0_i32_0 : i32, i32
  }
  func.func @transform_4(%arg0: i32) -> (i32, i32) {
    %c0_i32 = arith.constant 0 : i32
    %c0_i32_0 = arith.constant 0 : i32
    return %arg0, %c0_i32 : i32, i32
  }
}

</mosaic_0001>

<bundles_post_ra>
// kernel: tpu_custom_call.1
= control target key start
LH: loop header
LB: loop body
LE: loop exit
PB: predicated region body
PF: predicated region fallthrough
CT: control target
= control target key end

     0   :  { %9 = vsyncpa [#allocation4], 0  ;;  %s4241_s0 = inlined_call_operand.vmem [shape: bf16[1056,16], index: 0, kind: input, shape index: {}]   ;;  %s4242_s1 = inlined_call_operand.vmem [shape: bf16[1056,16], index: 1, kind: input, shape index: {}]   ;;  %s4243_s2 = inlined_call_operand.vmem [shape: bf16[4,16,128], index: 2, kind: input, shape index: {}]   ;;  %s4244_s3 = inlined_call_operand.vmem [shape: f32[1,128], index: 3, kind: input, shape index: {}]   ;;  %s4245_s4 = inlined_call_operand.hbm [shape: bf16[1024,128], index: 4, kind: output, shape index: {}]  }
   0x1   :  { %11 = vsyncpa [#allocation4 + $0x1], 0  ;;  %s3659_s15 = smov 0   ;;  %s3661_s16 = smov 0  }
   0x2   :  { %s3663_s17 = smov 0   ;;  %s3665_s18 = smov 0  }
   0x3 LB: > { %s3680_s19 = sadd.s32 4294967295, %s3630_s18   ;;  %s2982_s20 = sadd.s32 4294967294, %s3630_s18   ;;  %s3630_s18 = sphi %s3665_s18, %s4251_s18   ;;  %s3626_s17 = sphi %s3663_s17, %s4250_s17   ;;  %s3622_s16 = sphi %s3661_s16, %s4249_s16   ;;  %s3618_s15 = sphi %s3659_s15, %s4248_s15  }
   0x4   : > { %s3684_s21 = sadd.s32 1, %s3630_s18   ;;  %s122_s22 = sadd.s32 1, %s3626_s17 }
   0x5   : > { %s119_s23 = ssub.s32 %s3630_s18, %s3684_s21  ;;  %p132_p0 = scmp.ne.s32.totalorder %s3626_s17, %s3622_s16 }
   0x6   : > { %p120_p1 = scmp.eq.s32.totalorder %s119_s23, 0  ;;  %p133_p2 = scmp.eq.s32.totalorder %s3680_s19, 1 }
   0x7   : > { %p138_p3 = scmp.ne.s32.totalorder %s3622_s16, %s3618_s15  ;;  %p139_p4 = scmp.eq.s32.totalorder %s2982_s20, 1 }
   0x8   : > { %s3695_s24 = scalar_select %p120_p1, %s3626_s17, %s122_s22  }
   0x9   : > { %p3697_p5 = por %p133_p2, %p132_p0  ;;  %p3701_p6 = por %p139_p4, %p138_p3 }
   0xa   : > { %p2987_p7 = scmp.ge.s32.totalorder %s3630_s18, 1  ;;  %p193_p8 = scmp.lt.s32.totalorder %s3630_s18, 3 }
   0xc   : > { %p194_p9 = pnand %p2987_p7, %p193_p8 }
   0xd   : > { %s3714_s5 = sshll.u32 (!%p194_p9), %s3680_s19, 6  ;;  %s227_s23 = sand.u32 (!%p194_p9), 1, %s3622_s16  }
   0xe   : > { %197 = sbr.rel (%p194_p9) target bundleno = 683 (0x2ab), region = 36  ;;  %p235_p10 = scmp.lt.s32.totalorder (!%p194_p9), %s3714_s5, 131 }
   0xf   : > { %s2988_s27 = sshll.u32 (!%p194_p9), %s227_s23, 8  ;;  %s3492_s6 = sadd.s32 (!%p194_p9), 64, %s3714_s5 }
  0x10   : > { %s3827_s28 = scalar_lea.vmem (!%p194_p9), [#allocation3], %s2988_s27  ;;  %p247_p11 = scmp.lt.s32.totalorder (!%p194_p9), %s3492_s6, 131 }
  0x11   : > { %s2893_s27 = scalar_lea.sflag (!%p194_p9), [#allocation4], %s227_s23  ;;  %s3588_s7 = scalar_lea.hbm (!%p194_p9), %s4245_s4, 512 }
  0x13   : > { %v3326_v0 = vld [vmem:[%s4243_s2] sm:$0xff]  ;;  %v3329_v1 = vld [vmem:[%s4243_s2 + $0x18] sm:$0xff]  ;;  %v3327_v2 = vld [vmem:[%s4243_s2 + $0x8] sm:$0xff]  ;;  %s236_s10 = scalar_select %p235_p10, %s3714_s5, 131  ;;  %vm502_vm0 = vcmask 130048   ;;  %vm1975_vm1 = vcmask 1046528  }
  0x14   : > { %v3328_v3 = vld [vmem:[%s4243_s2 + $0x10] sm:$0xff]  ;;  %606 = vmatpush.bf16.msra.mxu0 %v3326_v0  ;;  %2150 = vmatpush.bf16.msra.mxu3 %v3329_v1  ;;  %vm899_vm2 = vsmask.f32 7424  ;;  %s4253_s6 = smov (!%p247_p11, %s3492_s6), 131 }
  0x15   : > { %1237 = vmatpush.bf16.msra.mxu1 %v3327_v2  ;;  %1618 = vmatpush.bf16.msra.mxu2 %v3328_v3  ;;  %s2990_s11 = sshll.u32 %s236_s10, 2  ;;  %s2993_s5 = sshll.u32 %s4253_s6, 2 }
  0x16   : > { %s3727_s14 = scalar_lea.vmem %s4241_s0, %s2990_s11  ;;  %s4149_s9 = scalar_lea.vmem %s4242_s1, %s2993_s5 }
  0x17   : > { %v3292_v4 = vld [vmem:[%s3727_s14] sm:$0xff]  ;;  %v3293_v5 = vld [vmem:[%s3727_s14 + $0x8] sm:$0xff]  ;;  %v3294_v6 = vld [vmem:[%s3727_s14 + $0x10] sm:$0xff]  ;;  %s3330_s10 = sshll.u32 %s3680_s19, 8  ;;  %s2905_s19 = sshll.u32 %s3827_s28, 4  ;;  %s2906_s19 = int_to_ptr.vmem [resolvable:$true] %s2905_s19 }
  0x18   : > { %3134 = vmatmul.msk.bf16.vlgmr.msra.gmra.mxu0 %vm502_vm0, %v3292_v4  ;;  %v902_v7 = vshll.u32 %v3292_v4, 16  ;;  %v1976_v8 = vrot.slane %v3293_v5, 1  ;;  %v1977_v9 = vrot.slane %v3294_v6, 1  ;;  %v900_v10 = vshrl.u32 %v3292_v4, 16  ;;  %v3295_v22 = vld [vmem:[%s3727_s14 + $0x18] sm:$0xff]  ;;  %v3296_v30 = vld [vmem:[%s3727_s14 + $0x20] sm:$0xff]  ;;  %s2904_s13 = scalar_lea.hbm %s4245_s4, %s3330_s10 }
  0x19   : > { %v906_v11 = vshll.u32 %v3293_v5, 16  ;;  %v910_v12 = vshrl.u32 %v3293_v5, 16  ;;  %v913_v13 = vshll.u32 %v3294_v6, 16  ;;  %v1979_v23 = vrot.slane %v3295_v22, 1  ;;  %v3297_v38 = vld [vmem:[%s3727_s14 + $0x28] sm:$0xff]  ;;  %v3298_v46 = vld [vmem:[%s3727_s14 + $0x30] sm:$0xff] }
  0x1a   : > { %v1978_v14 = vsel %vm1975_vm1, %v1976_v8, %v1977_v9  ;;  %v904_v15 = vrot.slane %v902_v7, 1  ;;  %v917_v24 = vshrl.u32 %v3294_v6, 16  ;;  %v920_v25 = vshll.u32 %v3295_v22, 16  ;;  %v3299_v54 = vld [vmem:[%s3727_s14 + $0x38] sm:$0xff]  ;;  %v3300_v62 = vld [vmem:[%s3727_s14 + $0x40] sm:$0xff]  ;;  %s2907_s22 = sshll.u32 %s2904_s13, 4  ;;  %s2908_s22 = int_to_ptr.hbm [resolvable:$true] %s2907_s22 }
  0x1b   : > { %3248 = vmatmul.msk.bf16.vlgmr.msra.gmra.mxu3 %vm502_vm0, %v1978_v14  ;;  %v908_v16 = vrot.slane %v906_v11, 1  ;;  %v915_v17 = vrot.slane %v913_v13, 1  ;;  %v1980_v26 = vsel %vm1975_vm1, %v1977_v9, %v1979_v23  ;;  %v1981_v31 = vrot.slane %v3296_v30, 1  ;;  %v3789_v14 = vld [vmem:[%s3727_s14 + $0x50] sm:$0xff]  ;;  %s3582_s29 = sshra.s32 %s2908_s22, 4  ;;  %s3583_s29 = int_to_ptr.hbm [resolvable:$true] %s3582_s29 }
  0x1c   : > { %v905_v18 = vor.u32 %v904_v15, %v900_v10  ;;  %v922_v28 = vrot.slane %v920_v25, 1  ;;  %v924_v32 = vshrl.u32 %v3295_v22, 16  ;;  %v927_v33 = vshll.u32 %v3296_v30, 16  ;;  %s3584_s30 = scalar_lea.hbm %s3583_s29, 256  ;;  %p3589_p1 = scmp.lt.s32.totalorder %s3583_s29, %s4245_s4 }
  0x1d   : > { %v912_v19 = vor.u32 %v910_v12, %v908_v16  ;;  %v919_v27 = vor.u32 %v917_v24, %v915_v17  ;;  %v1982_v34 = vsel %vm1975_vm1, %v1979_v23, %v1981_v31  ;;  %v1983_v39 = vrot.slane %v3297_v38, 1  ;;  %p3585_p12 = scmp.ne.s32.totalorder %s3583_s29, %s3584_s30  ;;  %p3590_p2 = scmp.lt.s32.totalorder %s3588_s7, %s3584_s30 }
  0x1e   : > { %v909_v20 = vsel %vm899_vm2, %v905_v18, %v908_v16  ;;  %v926_v35 = vor.u32 %v924_v32, %v922_v28  ;;  %v929_v36 = vrot.slane %v927_v33, 1  ;;  %v931_v40 = vshrl.u32 %v3296_v30, 16 }
  0x1f   : > { %3172 = vmatmul.msk.bf16.vlgmr.msra.gmra.mxu1 %vm502_vm0, %v909_v20  ;;  %v916_v21 = vsel %vm899_vm2, %v912_v19, %v915_v17  ;;  %v923_v29 = vsel %vm899_vm2, %v919_v27, %v922_v28  ;;  %v934_v41 = vshll.u32 %v3297_v38, 16  ;;  %v1984_v42 = vsel %vm1975_vm1, %v1981_v31, %v1983_v39  ;;  %v3800_v27 = vld [vmem:[%s3727_s14 + $0x58] sm:$0xff]  ;;  %p3586_p13 = pnand %p3585_p12, %p3697_p5  ;;  %p3591_p3 = por %p3590_p2, %p3589_p1 }
  0x20   : > { %3210 = vmatmul.msk.bf16.vlgmr.msra.gmra.mxu2 %vm502_vm0, %v916_v21  ;;  %v930_v37 = vsel %vm899_vm2, %v926_v35, %v929_v36  ;;  %v933_v43 = vor.u32 %v931_v40, %v929_v36  ;;  %v1985_v47 = vrot.slane %v3298_v46, 1  ;;  %v938_v48 = vshrl.u32 %v3297_v38, 16 }
  0x21   : > { %v936_v44 = vrot.slane %v934_v41, 1  ;;  %v941_v49 = vshll.u32 %v3298_v46, 16  ;;  %v1987_v55 = vrot.slane %v3299_v54, 1  ;;  %v945_v56 = vshrl.u32 %v3298_v46, 16  ;;  %p3587_p0 = pneg %p3586_p13 }
  0x22   : > { %v1986_v50 = vsel %vm1975_vm1, %v1983_v39, %v1985_v47  ;;  %v948_v57 = vshll.u32 %v3299_v54, 16  ;;  %v1989_v63 = vrot.slane %v3300_v62, 1  ;;  %v952_v0 = vshrl.u32 %v3299_v54, 16 }
  0x23   : > { %v937_v45 = vsel %vm899_vm2, %v933_v43, %v936_v44  ;;  %v940_v51 = vor.u32 %v938_v48, %v936_v44  ;;  %v943_v52 = vrot.slane %v941_v49, 1  ;;  %v1988_v58 = vsel %vm1975_vm1, %v1985_v47, %v1987_v55  ;;  %p3592_p4 = pnand %p3591_p3, %p3587_p0 }
  0x24   : > { %v950_v60 = vrot.slane %v948_v57, 1  ;;  %v955_v1 = vshll.u32 %v3300_v62, 16  ;;  %v1990_v2 = vsel %vm1975_vm1, %v1987_v55, %v1989_v63  ;;  %v959_v8 = vshrl.u32 %v3300_v62, 16 }
  0x25   : > { %v944_v53 = vsel %vm899_vm2, %v940_v51, %v943_v52  ;;  %v947_v59 = vor.u32 %v945_v56, %v943_v52  ;;  %v1993_v15 = vrot.slane %v3789_v14, 1  ;;  %v969_v18 = vshll.u32 %v3789_v14, 16 }
  0x26   : > { %v954_v3 = vor.u32 %v952_v0, %v950_v60  ;;  %v957_v4 = vrot.slane %v955_v1, 1  ;;  %v1995_v31 = vrot.slane %v3800_v27, 1  ;;  %v973_v33 = vshrl.u32 %v3789_v14, 16 }
  0x27   : > { %v951_v61 = vsel %vm899_vm2, %v947_v59, %v950_v60 }
  0x28   : > { %3135 = vmatmul.msk.bf16.gmra.mxu0 %vm502_vm0, %v3293_v5  ;;  %v958_v5 = vsel %vm899_vm2, %v954_v3, %v957_v4  ;;  %v961_v11 = vor.u32 %v959_v8, %v957_v4 }
  0x2b   : > { %3249 = vmatmul.msk.bf16.gmra.mxu3 %vm502_vm0, %v1980_v26 }
  0x2f   : > { %3173 = vmatmul.msk.bf16.gmra.mxu1 %vm502_vm0, %v916_v21  ;;  %v971_v21 = vrot.slane %v969_v18, 1  ;;  %v3840_v18 = vld [vmem:[%s3727_s14 + $0x68] sm:$0xff] }
  0x30   : > { %3211 = vmatmul.msk.bf16.gmra.mxu2 %vm502_vm0, %v923_v29 }
  0x31   : > { %v975_v39 = vor.u32 %v973_v33, %v971_v21 }
  0x38   : > { %3136 = vmatmul.msk.bf16.gmra.mxu0 %vm502_vm0, %v3294_v6  ;;  %v3301_v6 = vld [vmem:[%s3727_s14 + $0x48] sm:$0xff] }
  0x39   : > { %v1991_v7 = vrot.slane %v3301_v6, 1  ;;  %v962_v9 = vshll.u32 %v3301_v6, 16  ;;  %v966_v17 = vshrl.u32 %v3301_v6, 16 }
  0x3b   : > { %3250 = vmatmul.msk.bf16.gmra.mxu3 %vm502_vm0, %v1982_v34  ;;  %v1992_v10 = vsel %vm1975_vm1, %v1989_v63, %v1991_v7  ;;  %v964_v12 = vrot.slane %v962_v9, 1  ;;  %v1994_v19 = vsel %vm1975_vm1, %v1991_v7, %v1993_v15  ;;  %v976_v34 = vshll.u32 %v3800_v27, 16 }
  0x3c   : > { %v980_v63 = vshrl.u32 %v3800_v27, 16 }
  0x3d   : > { %v965_v13 = vsel %vm899_vm2, %v961_v11, %v964_v12  ;;  %v968_v20 = vor.u32 %v966_v17, %v964_v12  ;;  %v978_v40 = vrot.slane %v976_v34, 1 }
  0x3f   : > { %3174 = vmatmul.msk.bf16.gmra.mxu1 %vm502_vm0, %v923_v29  ;;  %v972_v23 = vsel %vm899_vm2, %v968_v20, %v971_v21  ;;  %v982_v4 = vor.u32 %v980_v63, %v978_v40 }
  0x40   : > { %3212 = vmatmul.msk.bf16.gmra.mxu2 %vm502_vm0, %v930_v37 }
  0x48   : > { %3137 = vmatmul.msk.bf16.gmra.mxu0 %vm502_vm0, %v3295_v22 }
  0x4b   : > { %3251 = vmatmul.msk.bf16.gmra.mxu3 %vm502_vm0, %v1984_v42 }
  0x4f   : > { %3175 = vmatmul.msk.bf16.gmra.mxu1 %vm502_vm0, %v930_v37  ;;  %v3808_v37 = vld [vmem:[%s4244_s3] ss:$0 sm:$0xff] }
  0x50   : > { %3213 = vmatmul.msk.bf16.gmra.mxu2 %vm502_vm0, %v937_v45 }
  0x58   : > { %3138 = vmatmul.msk.bf16.gmra.mxu0 %vm502_vm0, %v3296_v30 }
  0x5b   : > { %3252 = vmatmul.msk.bf16.gmra.mxu3 %vm502_vm0, %v1986_v50 }
  0x5f   : > { %3176 = vmatmul.msk.bf16.gmra.mxu1 %vm502_vm0, %v937_v45 }
  0x60   : > { %3214 = vmatmul.msk.bf16.gmra.mxu2 %vm502_vm0, %v944_v53 }
  0x68   : > { %3139 = vmatmul.msk.bf16.gmra.mxu0 %vm502_vm0, %v3297_v38  ;;  %v1996_v38 = vsel %vm1975_vm1, %v1993_v15, %v1995_v31 }
  0x6b   : > { %3253 = vmatmul.msk.bf16.gmra.mxu3 %vm502_vm0, %v1988_v58 }
  0x6f   : > { %3177 = vmatmul.msk.bf16.gmra.mxu1 %vm502_vm0, %v944_v53  ;;  %v3820_v53 = vld [vmem:[%s3727_s14 + $0x60] sm:$0xff] }
  0x70   : > { %3215 = vmatmul.msk.bf16.gmra.mxu2 %vm502_vm0, %v951_v61  ;;  %v1997_v60 = vrot.slane %v3820_v53, 1  ;;  %v983_v0 = vshll.u32 %v3820_v53, 16 }
  0x72   : > { %v1998_v3 = vsel %vm1975_vm1, %v1995_v31, %v1997_v60 }
  0x78   : > { %3140 = vmatmul.msk.bf16.gmra.mxu0 %vm502_vm0, %v3298_v46  ;;  %v979_v46 = vsel %vm899_vm2, %v975_v39, %v978_v40 }
  0x7b   : > { %3254 = vmatmul.msk.bf16.gmra.mxu3 %vm502_vm0, %v1990_v2 }
  0x7f   : > { %3178 = vmatmul.msk.bf16.gmra.mxu1 %vm502_vm0, %v951_v61 }
  0x80   : > { %3216 = vmatmul.msk.bf16.gmra.mxu2 %vm502_vm0, %v958_v5 }
  0x88   : > { %3141 = vmatmul.msk.bf16.gmra.mxu0 %vm502_vm0, %v3299_v54 }
  0x8b   : > { %3255 = vmatmul.msk.bf16.gmra.mxu3 %vm502_vm0, %v1992_v10 }
  0x8f   : > { %3179 = vmatmul.msk.bf16.gmra.mxu1 %vm502_vm0, %v958_v5  ;;  %v985_v5 = vrot.slane %v983_v0, 1 }
  0x90   : > { %3217 = vmatmul.msk.bf16.gmra.mxu2 %vm502_vm0, %v965_v13 }
  0x91   : > { %v986_v11 = vsel %vm899_vm2, %v982_v4, %v985_v5 }
  0x95   : > { %v608_v16 = vpop.f32.mrf.mxu0 }
  0x98   : > { %3142 = vmatmul.msk.bf16.gmra.mxu0 %vm502_vm0, %v3300_v62 }
  0x9b   : > { %3256 = vmatmul.msk.bf16.gmra.mxu3 %vm502_vm0, %v1994_v19 }
  0x9c   : > { %v1239_v22 = vpop.f32.mrf.mxu1 }
  0x9d   : > { %v610_v24 = vpop.f32.mrf.mxu0  ;;  %v1399_v26 = vadd.f32 %v1239_v22, %v608_v16 }
  0x9e   : > { %v2152_v25 = vpop.f32.mrf.mxu3 }
  0x9f   : > { %3180 = vmatmul.msk.bf16.gmra.mxu1 %vm502_vm0, %v965_v13 }
  0xa0   : > { %3218 = vmatmul.msk.bf16.gmra.mxu2 %vm502_vm0, %v972_v23 }
  0xa3   : > { %v1620_v28 = vpop.f32.mrf.mxu2 }
  0xa4   : > { %v1780_v29 = vadd.f32 %v1620_v28, %v1399_v26  ;;  %v1241_v30 = vpop.f32.mrf.mxu1 }
  0xa5   : > { %v613_v32 = vpop.f32.mrf.mxu0  ;;  %v1400_v41 = vadd.f32 %v1241_v30, %v610_v24  ;;  %v990_v30 = vshll.u32 %v3840_v18, 16 }
  0xa6   : > { %v2154_v35 = vpop.f32.mrf.mxu3  ;;  %v2312_v36 = vadd.f32 %v2152_v25, %v1780_v29  ;;  %v1999_v25 = vrot.slane %v3840_v18, 1  ;;  %v987_v29 = vshrl.u32 %v3820_v53, 16 }
  0xa8   : > { %3143 = vmatmul.msk.bf16.gmra.mxu0 %vm502_vm0, %v3301_v6  ;;  %v2508_v43 = vadd.f32 %v3808_v37, %v2312_v36  ;;  %v2000_v33 = vsel %vm1975_vm1, %v1997_v60, %v1999_v25  ;;  %v989_v34 = vor.u32 %v987_v29, %v985_v5 }
  0xaa   : > { %v2636_v50 = vmul.f32 0.2, %v2508_v43  ;;  %vm2572_vm3 = vcmp.gt.f32.partialorder %v2508_v43, 0.0 }
  0xab   : > { %v1622_v42 = vpop.f32.mrf.mxu2  ;;  %3257 = vmatmul.msk.bf16.gmra.mxu3 %vm502_vm0, %v1996_v38 }
  0xac   : > { %v1781_v44 = vadd.f32 %v1622_v42, %v1400_v41  ;;  %v1244_v45 = vpop.f32.mrf.mxu1  ;;  %v2700_v56 = vsel %vm2572_vm3, %v2508_v43, %v2636_v50 }
  0xad   : > { %v615_v47 = vpop.f32.mrf.mxu0  ;;  %v1401_v52 = vadd.f32 %v1244_v45, %v613_v32 }
  0xae   : > { %v2313_v48 = vadd.f32 %v2154_v35, %v1781_v44  ;;  %v2157_v49 = vpop.f32.mrf.mxu3  ;;  %v992_v35 = vrot.slane %v990_v30, 1 }
  0xaf   : > { %3181 = vmatmul.msk.bf16.gmra.mxu1 %vm502_vm0, %v972_v23 }
  0xb0   : > { %v2509_v51 = vadd.f32 %v3808_v37, %v2313_v48  ;;  %3219 = vmatmul.msk.bf16.gmra.mxu2 %vm502_vm0, %v979_v46  ;;  %v993_v42 = vsel %vm899_vm2, %v989_v34, %v992_v35  ;;  %v3856_v48 = vld [vmem:[%s3727_s14 + $0x70] sm:$0xff] }
  0xb1   : > { %v997_v60 = vshll.u32 %v3856_v48, 16 }
  0xb2   : > { %vm2573_vm4 = vcmp.gt.f32.partialorder %v2509_v51, 0.0  ;;  %v2637_v54 = vmul.f32 0.2, %v2509_v51 }
  0xb3   : > { %v1625_v55 = vpop.f32.mrf.mxu2 }
  0xb4   : > { %v2701_v57 = vsel %vm2573_vm4, %v2509_v51, %v2637_v54  ;;  %v1782_v58 = vadd.f32 %v1625_v55, %v1401_v52  ;;  %v1246_v59 = vpop.f32.mrf.mxu1 }
  0xb5   : > { %v3334_v61 = vpack.c.bf16 %v2701_v57, %v2700_v56  ;;  %v618_v62 = vpop.f32.mrf.mxu0  ;;  %v1402_v6 = vadd.f32 %v1246_v59, %v615_v47  ;;  %v2001_v56 = vrot.slane %v3856_v48, 1  ;;  %v994_v59 = vshrl.u32 %v3840_v18, 16 }
  0xb6   : > { %v2159_v1 = vpop.f32.mrf.mxu3  ;;  %v2314_v2 = vadd.f32 %v2157_v49, %v1782_v58 }
  0xb7   : > { %3335 = vst [vmem:[%s3827_s28] sm:$0xff] %v3334_v61   ;;  %v2002_v63 = vsel %vm1975_vm1, %v1999_v25, %v2001_v56  ;;  %v996_v0 = vor.u32 %v994_v59, %v992_v35 }
  0xb8   : > { %3144 = vmatmul.msk.bf16.gmra.mxu0 %vm502_vm0, %v3789_v14  ;;  %v2510_v8 = vadd.f32 %v3808_v37, %v2314_v2 }
  0xba   : > { %v2638_v14 = vmul.f32 0.2, %v2510_v8  ;;  %vm2574_vm5 = vcmp.gt.f32.partialorder %v2510_v8, 0.0 }
  0xbb   : > { %v1627_v7 = vpop.f32.mrf.mxu2  ;;  %3258 = vmatmul.msk.bf16.gmra.mxu3 %vm502_vm0, %v1998_v3 }
  0xbc   : > { %v1783_v9 = vadd.f32 %v1627_v7, %v1402_v6  ;;  %v1249_v10 = vpop.f32.mrf.mxu1  ;;  %v2702_v21 = vsel %vm2574_vm5, %v2510_v8, %v2638_v14 }
  0xbd   : > { %v620_v12 = vpop.f32.mrf.mxu0  ;;  %v1403_v17 = vadd.f32 %v1249_v10, %v618_v62 }
  0xbe   : > { %v2315_v13 = vadd.f32 %v2159_v1, %v1783_v9  ;;  %v2162_v15 = vpop.f32.mrf.mxu3  ;;  %v999_v1 = vrot.slane %v997_v60, 1 }
  0xbf   : > { %3182 = vmatmul.msk.bf16.gmra.mxu1 %vm502_vm0, %v979_v46 }
  0xc0   : > { %v2511_v16 = vadd.f32 %v3808_v37, %v2315_v13  ;;  %3220 = vmatmul.msk.bf16.gmra.mxu2 %vm502_vm0, %v986_v11  ;;  %v1000_v7 = vsel %vm899_vm2, %v996_v0, %v999_v1  ;;  %v3872_v13 = vld [vmem:[%s3727_s14 + $0x78] sm:$0xff] }
  0xc1   : > { %v1004_v25 = vshll.u32 %v3872_v13, 16 }
  0xc2   : > { %vm2575_vm6 = vcmp.gt.f32.partialorder %v2511_v16, 0.0  ;;  %v2639_v19 = vmul.f32 0.2, %v2511_v16 }
  0xc3   : > { %v1630_v20 = vpop.f32.mrf.mxu2 }
  0xc4   : > { %v2703_v22 = vsel %vm2575_vm6, %v2511_v16, %v2639_v19  ;;  %v1784_v23 = vadd.f32 %v1630_v20, %v1403_v17  ;;  %v1251_v24 = vpop.f32.mrf.mxu1 }
  0xc5   : > { %v3339_v26 = vpack.c.bf16 %v2703_v22, %v2702_v21  ;;  %v623_v28 = vpop.f32.mrf.mxu0  ;;  %v1404_v36 = vadd.f32 %v1251_v24, %v620_v12  ;;  %v2003_v21 = vrot.slane %v3872_v13, 1  ;;  %v1001_v24 = vshrl.u32 %v3856_v48, 16 }
  0xc6   : > { %v2164_v31 = vpop.f32.mrf.mxu3  ;;  %v2316_v32 = vadd.f32 %v2162_v15, %v1784_v23 }
  0xc7   : > { %3493 = vst [vmem:[%s3827_s28 + $0x8] sm:$0xff] %v3339_v26   ;;  %v2004_v29 = vsel %vm1975_vm1, %v2001_v56, %v2003_v21  ;;  %v1003_v30 = vor.u32 %v1001_v24, %v999_v1 }
  0xc8   : > { %3145 = vmatmul.msk.bf16.gmra.mxu0 %vm502_vm0, %v3800_v27  ;;  %v2512_v39 = vadd.f32 %v3808_v37, %v2316_v32 }
  0xca   : > { %v2640_v27 = vmul.f32 0.2, %v2512_v39  ;;  %vm2576_vm7 = vcmp.gt.f32.partialorder %v2512_v39, 0.0 }
  0xcb   : > { %v1632_v38 = vpop.f32.mrf.mxu2  ;;  %3259 = vmatmul.msk.bf16.gmra.mxu3 %vm502_vm0, %v2000_v33 }
  0xcc   : > { %v1785_v40 = vadd.f32 %v1632_v38, %v1404_v36  ;;  %v1254_v41 = vpop.f32.mrf.mxu1  ;;  %v2704_v51 = vsel %vm2576_vm7, %v2512_v39, %v2640_v27 }
  0xcd   : > { %v625_v43 = vpop.f32.mrf.mxu0  ;;  %v1405_v47 = vadd.f32 %v1254_v41, %v623_v28 }
  0xce   : > { %v2317_v44 = vadd.f32 %v2164_v31, %v1785_v40  ;;  %v2167_v45 = vpop.f32.mrf.mxu3  ;;  %v1006_v31 = vrot.slane %v1004_v25, 1 }
  0xcf   : > { %3183 = vmatmul.msk.bf16.gmra.mxu1 %vm502_vm0, %v986_v11 }
  0xd0   : > { %v2513_v46 = vadd.f32 %v3808_v37, %v2317_v44  ;;  %3221 = vmatmul.msk.bf16.gmra.mxu2 %vm502_vm0, %v993_v42  ;;  %v1007_v38 = vsel %vm899_vm2, %v1003_v30, %v1006_v31  ;;  %v3888_v44 = vld [vmem:[%s3727_s14 + $0x80] sm:$0xff] }
  0xd1   : > { %v1011_v56 = vshll.u32 %v3888_v44, 16 }
  0xd2   : > { %vm2577_vm8 = vcmp.gt.f32.partialorder %v2513_v46, 0.0  ;;  %v2641_v49 = vmul.f32 0.2, %v2513_v46 }
  0xd3   : > { %v1635_v50 = vpop.f32.mrf.mxu2 }
  0xd4   : > { %v2705_v52 = vsel %vm2577_vm8, %v2513_v46, %v2641_v49  ;;  %v1786_v54 = vadd.f32 %v1635_v50, %v1405_v47  ;;  %v1256_v55 = vpop.f32.mrf.mxu1 }
  0xd5   : > { %v3344_v57 = vpack.c.bf16 %v2705_v52, %v2704_v51  ;;  %v628_v58 = vpop.f32.mrf.mxu0  ;;  %v1406_v2 = vadd.f32 %v1256_v55, %v625_v43  ;;  %v2005_v51 = vrot.slane %v3888_v44, 1  ;;  %v1008_v55 = vshrl.u32 %v3872_v13, 16 }
  0xd6   : > { %v2169_v61 = vpop.f32.mrf.mxu3  ;;  %v2318_v62 = vadd.f32 %v2167_v45, %v1786_v54 }
  0xd7   : > { %3494 = vst [vmem:[%s3827_s28 + $0x10] sm:$0xff] %v3344_v57   ;;  %v2006_v59 = vsel %vm1975_vm1, %v2003_v21, %v2005_v51  ;;  %v1010_v60 = vor.u32 %v1008_v55, %v1006_v31 }
  0xd8   : > { %3146 = vmatmul.msk.bf16.gmra.mxu0 %vm502_vm0, %v3820_v53  ;;  %v2514_v4 = vadd.f32 %v3808_v37, %v2318_v62 }
  0xda   : > { %v2642_v53 = vmul.f32 0.2, %v2514_v4  ;;  %vm2578_vm9 = vcmp.gt.f32.partialorder %v2514_v4, 0.0 }
  0xdb   : > { %v1637_v3 = vpop.f32.mrf.mxu2  ;;  %3260 = vmatmul.msk.bf16.gmra.mxu3 %vm502_vm0, %v2002_v63 }
  0xdc   : > { %v1787_v5 = vadd.f32 %v1637_v3, %v1406_v2  ;;  %v1259_v6 = vpop.f32.mrf.mxu1  ;;  %v2706_v16 = vsel %vm2578_vm9, %v2514_v4, %v2642_v53 }
  0xdd   : > { %v630_v8 = vpop.f32.mrf.mxu0  ;;  %v1407_v12 = vadd.f32 %v1259_v6, %v628_v58 }
  0xde   : > { %v2319_v9 = vadd.f32 %v2169_v61, %v1787_v5  ;;  %v2172_v10 = vpop.f32.mrf.mxu3  ;;  %v1013_v61 = vrot.slane %v1011_v56, 1 }
  0xdf   : > { %3184 = vmatmul.msk.bf16.gmra.mxu1 %vm502_vm0, %v993_v42 }
  0xe0   : > { %v2515_v11 = vadd.f32 %v3808_v37, %v2319_v9  ;;  %3222 = vmatmul.msk.bf16.gmra.mxu2 %vm502_vm0, %v1000_v7  ;;  %v1014_v3 = vsel %vm899_vm2, %v1010_v60, %v1013_v61  ;;  %v3904_v9 = vld [vmem:[%s3727_s14 + $0x88] sm:$0xff] }
  0xe1   : > { %v1018_v21 = vshll.u32 %v3904_v9, 16 }
  0xe2   : > { %vm2579_vm10 = vcmp.gt.f32.partialorder %v2515_v11, 0.0  ;;  %v2643_v15 = vmul.f32 0.2, %v2515_v11 }
  0xe3   : > { %v1640_v14 = vpop.f32.mrf.mxu2 }
  0xe4   : > { %v2707_v17 = vsel %vm2579_vm10, %v2515_v11, %v2643_v15  ;;  %v1788_v19 = vadd.f32 %v1640_v14, %v1407_v12  ;;  %v1261_v20 = vpop.f32.mrf.mxu1 }
  0xe5   : > { %v3349_v22 = vpack.c.bf16 %v2707_v17, %v2706_v16  ;;  %v633_v23 = vpop.f32.mrf.mxu0  ;;  %v1408_v32 = vadd.f32 %v1261_v20, %v630_v8  ;;  %v2007_v16 = vrot.slane %v3904_v9, 1  ;;  %v1015_v20 = vshrl.u32 %v3888_v44, 16 }
  0xe6   : > { %v2174_v26 = vpop.f32.mrf.mxu3  ;;  %v2320_v28 = vadd.f32 %v2172_v10, %v1788_v19 }
  0xe7   : > { %3495 = vst [vmem:[%s3827_s28 + $0x18] sm:$0xff] %v3349_v22   ;;  %v2008_v24 = vsel %vm1975_vm1, %v2005_v51, %v2007_v16  ;;  %v1017_v25 = vor.u32 %v1015_v20, %v1013_v61 }
  0xe8   : > { %3147 = vmatmul.msk.bf16.gmra.mxu0 %vm502_vm0, %v3840_v18  ;;  %v2516_v34 = vadd.f32 %v3808_v37, %v2320_v28 }
  0xea   : > { %v2644_v18 = vmul.f32 0.2, %v2516_v34  ;;  %vm2580_vm11 = vcmp.gt.f32.partialorder %v2516_v34, 0.0 }
  0xeb   : > { %v1642_v33 = vpop.f32.mrf.mxu2  ;;  %3261 = vmatmul.msk.bf16.gmra.mxu3 %vm502_vm0, %v2004_v29 }
  0xec   : > { %v1789_v35 = vadd.f32 %v1642_v33, %v1408_v32  ;;  %v1264_v36 = vpop.f32.mrf.mxu1  ;;  %v2708_v46 = vsel %vm2580_vm11, %v2516_v34, %v2644_v18 }
  0xed   : > { %v635_v39 = vpop.f32.mrf.mxu0  ;;  %v1409_v43 = vadd.f32 %v1264_v36, %v633_v23 }
  0xee   : > { %v2321_v40 = vadd.f32 %v2174_v26, %v1789_v35  ;;  %v2177_v41 = vpop.f32.mrf.mxu3  ;;  %v1020_v26 = vrot.slane %v1018_v21, 1 }
  0xef   : > { %3185 = vmatmul.msk.bf16.gmra.mxu1 %vm502_vm0, %v1000_v7 }
  0xf0   : > { %v2517_v42 = vadd.f32 %v3808_v37, %v2321_v40  ;;  %3223 = vmatmul.msk.bf16.gmra.mxu2 %vm502_vm0, %v1007_v38  ;;  %v1021_v33 = vsel %vm899_vm2, %v1017_v25, %v1020_v26  ;;  %v3920_v40 = vld [vmem:[%s3727_s14 + $0x90] sm:$0xff] }
  0xf1   : > { %v1025_v51 = vshll.u32 %v3920_v40, 16 }
  0xf2   : > { %vm2581_vm12 = vcmp.gt.f32.partialorder %v2517_v42, 0.0  ;;  %v2645_v45 = vmul.f32 0.2, %v2517_v42 }
  0xf3   : > { %v1645_v27 = vpop.f32.mrf.mxu2 }
  0xf4   : > { %v2709_v47 = vsel %vm2581_vm12, %v2517_v42, %v2645_v45  ;;  %v1790_v49 = vadd.f32 %v1645_v27, %v1409_v43  ;;  %v1266_v50 = vpop.f32.mrf.mxu1 }
  0xf5   : > { %v3354_v52 = vpack.c.bf16 %v2709_v47, %v2708_v46  ;;  %v638_v54 = vpop.f32.mrf.mxu0  ;;  %v1410_v62 = vadd.f32 %v1266_v50, %v635_v39  ;;  %v2009_v46 = vrot.slane %v3920_v40, 1  ;;  %v1022_v50 = vshrl.u32 %v3904_v9, 16 }
  0xf6   : > { %v2179_v57 = vpop.f32.mrf.mxu3  ;;  %v2322_v58 = vadd.f32 %v2177_v41, %v1790_v49 }
  0xf7   : > { %3496 = vst [vmem:[%s3827_s28 + $0x20] sm:$0xff] %v3354_v52   ;;  %v2010_v55 = vsel %vm1975_vm1, %v2007_v16, %v2009_v46  ;;  %v1024_v56 = vor.u32 %v1022_v50, %v1020_v26 }
  0xf8   : > { %3148 = vmatmul.msk.bf16.gmra.mxu0 %vm502_vm0, %v3856_v48  ;;  %v2518_v0 = vadd.f32 %v3808_v37, %v2322_v58 }
  0xfa   : > { %v2646_v48 = vmul.f32 0.2, %v2518_v0  ;;  %vm2582_vm13 = vcmp.gt.f32.partialorder %v2518_v0, 0.0 }
  0xfb   : > { %v1647_v63 = vpop.f32.mrf.mxu2  ;;  %3262 = vmatmul.msk.bf16.gmra.mxu3 %vm502_vm0, %v2006_v59 }
  0xfc   : > { %v1791_v1 = vadd.f32 %v1647_v63, %v1410_v62  ;;  %v1269_v2 = vpop.f32.mrf.mxu1  ;;  %v2710_v11 = vsel %vm2582_vm13, %v2518_v0, %v2646_v48 }
  0xfd   : > { %v640_v4 = vpop.f32.mrf.mxu0  ;;  %v1411_v8 = vadd.f32 %v1269_v2, %v638_v54 }
  0xfe   : > { %v2323_v5 = vadd.f32 %v2179_v57, %v1791_v1  ;;  %v2182_v6 = vpop.f32.mrf.mxu3  ;;  %v1027_v57 = vrot.slane %v1025_v51, 1 }
  0xff   : > { %3186 = vmatmul.msk.bf16.gmra.mxu1 %vm502_vm0, %v1007_v38 }
 0x100   : > { %v2519_v7 = vadd.f32 %v3808_v37, %v2323_v5  ;;  %3224 = vmatmul.msk.bf16.gmra.mxu2 %vm502_vm0, %v1014_v3  ;;  %v1028_v63 = vsel %vm899_vm2, %v1024_v56, %v1027_v57  ;;  %v3936_v5 = vld [vmem:[%s3727_s14 + $0x98] sm:$0xff] }
 0x101   : > { %v1032_v16 = vshll.u32 %v3936_v5, 16 }
 0x102   : > { %vm2583_vm14 = vcmp.gt.f32.partialorder %v2519_v7, 0.0  ;;  %v2647_v10 = vmul.f32 0.2, %v2519_v7 }
 0x103   : > { %v1650_v53 = vpop.f32.mrf.mxu2 }
 0x104   : > { %v2711_v12 = vsel %vm2583_vm14, %v2519_v7, %v2647_v10  ;;  %v1792_v15 = vadd.f32 %v1650_v53, %v1411_v8  ;;  %v1271_v14 = vpop.f32.mrf.mxu1 }
 0x105   : > { %v3359_v17 = vpack.c.bf16 %v2711_v12, %v2710_v11  ;;  %v643_v19 = vpop.f32.mrf.mxu0  ;;  %v1412_v28 = vadd.f32 %v1271_v14, %v640_v4  ;;  %v2011_v11 = vrot.slane %v3936_v5, 1  ;;  %v1029_v14 = vshrl.u32 %v3920_v40, 16 }
 0x106   : > { %v2184_v22 = vpop.f32.mrf.mxu3  ;;  %v2324_v23 = vadd.f32 %v2182_v6, %v1792_v15 }
 0x107   : > { %3497 = vst [vmem:[%s3827_s28 + $0x28] sm:$0xff] %v3359_v17   ;;  %v2012_v20 = vsel %vm1975_vm1, %v2009_v46, %v2011_v11  ;;  %v1031_v21 = vor.u32 %v1029_v14, %v1027_v57 }
 0x108   : > { %3149 = vmatmul.msk.bf16.gmra.mxu0 %vm502_vm0, %v3872_v13  ;;  %v2520_v30 = vadd.f32 %v3808_v37, %v2324_v23 }
 0x10a   : > { %v2648_v13 = vmul.f32 0.2, %v2520_v30  ;;  %vm2584_vm15 = vcmp.gt.f32.partialorder %v2520_v30, 0.0 }
 0x10b   : > { %v1652_v29 = vpop.f32.mrf.mxu2  ;;  %3263 = vmatmul.msk.bf16.gmra.mxu3 %vm502_vm0, %v2008_v24 }
 0x10c   : > { %v1793_v31 = vadd.f32 %v1652_v29, %v1412_v28  ;;  %v1274_v32 = vpop.f32.mrf.mxu1  ;;  %v2712_v42 = vsel %vm2584_vm15, %v2520_v30, %v2648_v13 }
 0x10d   : > { %v645_v34 = vpop.f32.mrf.mxu0  ;;  %v1413_v39 = vadd.f32 %v1274_v32, %v643_v19 }
 0x10e   : > { %v2325_v35 = vadd.f32 %v2184_v22, %v1793_v31  ;;  %v2187_v36 = vpop.f32.mrf.mxu3  ;;  %v1034_v22 = vrot.slane %v1032_v16, 1 }
 0x10f   : > { %3187 = vmatmul.msk.bf16.gmra.mxu1 %vm502_vm0, %v1014_v3 }
 0x110   : > { %v2521_v38 = vadd.f32 %v3808_v37, %v2325_v35  ;;  %3225 = vmatmul.msk.bf16.gmra.mxu2 %vm502_vm0, %v1021_v33  ;;  %v1035_v29 = vsel %vm899_vm2, %v1031_v21, %v1034_v22  ;;  %v3952_v35 = vld [vmem:[%s3727_s14 + $0xa0] sm:$0xff] }
 0x111   : > { %v1039_v46 = vshll.u32 %v3952_v35, 16 }
 0x112   : > { %vm2585_vm3 = vcmp.gt.f32.partialorder %v2521_v38, 0.0  ;;  %v2649_v41 = vmul.f32 0.2, %v2521_v38 }
 0x113   : > { %v1655_v18 = vpop.f32.mrf.mxu2 }
 0x114   : > { %v2713_v43 = vsel %vm2585_vm3, %v2521_v38, %v2649_v41  ;;  %v1794_v45 = vadd.f32 %v1655_v18, %v1413_v39  ;;  %v1276_v27 = vpop.f32.mrf.mxu1 }
 0x115   : > { %v3364_v47 = vpack.c.bf16 %v2713_v43, %v2712_v42  ;;  %v648_v49 = vpop.f32.mrf.mxu0  ;;  %v1414_v58 = vadd.f32 %v1276_v27, %v645_v34  ;;  %v2013_v42 = vrot.slane %v3952_v35, 1  ;;  %v1036_v27 = vshrl.u32 %v3936_v5, 16 }
 0x116   : > { %v2189_v52 = vpop.f32.mrf.mxu3  ;;  %v2326_v54 = vadd.f32 %v2187_v36, %v1794_v45 }
 0x117   : > { %3498 = vst [vmem:[%s3827_s28 + $0x30] sm:$0xff] %v3364_v47   ;;  %v2014_v50 = vsel %vm1975_vm1, %v2011_v11, %v2013_v42  ;;  %v1038_v51 = vor.u32 %v1036_v27, %v1034_v22 }
 0x118   : > { %3150 = vmatmul.msk.bf16.gmra.mxu0 %vm502_vm0, %v3888_v44  ;;  %v2522_v60 = vadd.f32 %v3808_v37, %v2326_v54 }
 0x11a   : > { %v2650_v44 = vmul.f32 0.2, %v2522_v60  ;;  %vm2586_vm4 = vcmp.gt.f32.partialorder %v2522_v60, 0.0 }
 0x11b   : > { %v1657_v59 = vpop.f32.mrf.mxu2  ;;  %3264 = vmatmul.msk.bf16.gmra.mxu3 %vm502_vm0, %v2010_v55 }
 0x11c   : > { %v1795_v61 = vadd.f32 %v1657_v59, %v1414_v58  ;;  %v1279_v62 = vpop.f32.mrf.mxu1  ;;  %v2714_v7 = vsel %vm2586_vm4, %v2522_v60, %v2650_v44 }
 0x11d   : > { %v650_v0 = vpop.f32.mrf.mxu0  ;;  %v1415_v4 = vadd.f32 %v1279_v62, %v648_v49 }
 0x11e   : > { %v2327_v1 = vadd.f32 %v2189_v52, %v1795_v61  ;;  %v2192_v2 = vpop.f32.mrf.mxu3  ;;  %v1041_v52 = vrot.slane %v1039_v46, 1 }
 0x11f   : > { %3188 = vmatmul.msk.bf16.gmra.mxu1 %vm502_vm0, %v1021_v33 }
 0x120   : > { %v2523_v3 = vadd.f32 %v3808_v37, %v2327_v1  ;;  %3226 = vmatmul.msk.bf16.gmra.mxu2 %vm502_vm0, %v1028_v63  ;;  %v1042_v59 = vsel %vm899_vm2, %v1038_v51, %v1041_v52  ;;  %v3968_v1 = vld [vmem:[%s3727_s14 + $0xa8] sm:$0xff] }
 0x121   : > { %v1046_v11 = vshll.u32 %v3968_v1, 16 }
 0x122   : > { %vm2587_vm5 = vcmp.gt.f32.partialorder %v2523_v3, 0.0  ;;  %v2651_v6 = vmul.f32 0.2, %v2523_v3 }
 0x123   : > { %v1660_v48 = vpop.f32.mrf.mxu2 }
 0x124   : > { %v2715_v8 = vsel %vm2587_vm5, %v2523_v3, %v2651_v6  ;;  %v1796_v10 = vadd.f32 %v1660_v48, %v1415_v4  ;;  %v1281_v53 = vpop.f32.mrf.mxu1 }
 0x125   : > { %v3369_v12 = vpack.c.bf16 %v2715_v8, %v2714_v7  ;;  %v653_v15 = vpop.f32.mrf.mxu0  ;;  %v1416_v23 = vadd.f32 %v1281_v53, %v650_v0  ;;  %v2015_v7 = vrot.slane %v3968_v1, 1  ;;  %v1043_v53 = vshrl.u32 %v3952_v35, 16 }
 0x126   : > { %v2194_v17 = vpop.f32.mrf.mxu3  ;;  %v2328_v19 = vadd.f32 %v2192_v2, %v1796_v10 }
 0x127   : > { %3499 = vst [vmem:[%s3827_s28 + $0x38] sm:$0xff] %v3369_v12   ;;  %v2016_v14 = vsel %vm1975_vm1, %v2013_v42, %v2015_v7  ;;  %v1045_v16 = vor.u32 %v1043_v53, %v1041_v52 }
 0x128   : > { %3151 = vmatmul.msk.bf16.gmra.mxu0 %vm502_vm0, %v3904_v9  ;;  %v2524_v25 = vadd.f32 %v3808_v37, %v2328_v19 }
 0x12a   : > { %v2652_v9 = vmul.f32 0.2, %v2524_v25  ;;  %vm2588_vm6 = vcmp.gt.f32.partialorder %v2524_v25, 0.0 }
 0x12b   : > { %v1662_v24 = vpop.f32.mrf.mxu2  ;;  %3265 = vmatmul.msk.bf16.gmra.mxu3 %vm502_vm0, %v2012_v20 }
 0x12c   : > { %v1797_v26 = vadd.f32 %v1662_v24, %v1416_v23  ;;  %v1284_v28 = vpop.f32.mrf.mxu1  ;;  %v2716_v38 = vsel %vm2588_vm6, %v2524_v25, %v2652_v9 }
 0x12d   : > { %v655_v30 = vpop.f32.mrf.mxu0  ;;  %v1417_v34 = vadd.f32 %v1284_v28, %v653_v15 }
 0x12e   : > { %v2329_v31 = vadd.f32 %v2194_v17, %v1797_v26  ;;  %v2197_v32 = vpop.f32.mrf.mxu3  ;;  %v1048_v17 = vrot.slane %v1046_v11, 1 }
 0x12f   : > { %3189 = vmatmul.msk.bf16.gmra.mxu1 %vm502_vm0, %v1028_v63 }
 0x130   : > { %v2525_v33 = vadd.f32 %v3808_v37, %v2329_v31  ;;  %3227 = vmatmul.msk.bf16.gmra.mxu2 %vm502_vm0, %v1035_v29  ;;  %v1049_v24 = vsel %vm899_vm2, %v1045_v16, %v1048_v17  ;;  %v3984_v31 = vld [vmem:[%s3727_s14 + $0xb0] sm:$0xff] }
 0x131   : > { %v1053_v42 = vshll.u32 %v3984_v31, 16 }
 0x132   : > { %vm2589_vm7 = vcmp.gt.f32.partialorder %v2525_v33, 0.0  ;;  %v2653_v36 = vmul.f32 0.2, %v2525_v33 }
 0x133   : > { %v1665_v13 = vpop.f32.mrf.mxu2 }
 0x134   : > { %v2717_v39 = vsel %vm2589_vm7, %v2525_v33, %v2653_v36  ;;  %v1798_v41 = vadd.f32 %v1665_v13, %v1417_v34  ;;  %v1286_v18 = vpop.f32.mrf.mxu1 }
 0x135   : > { %v3374_v43 = vpack.c.bf16 %v2717_v39, %v2716_v38  ;;  %v658_v45 = vpop.f32.mrf.mxu0  ;;  %v1418_v54 = vadd.f32 %v1286_v18, %v655_v30  ;;  %v2017_v38 = vrot.slane %v3984_v31, 1  ;;  %v1050_v18 = vshrl.u32 %v3968_v1, 16 }
 0x136   : > { %v2199_v47 = vpop.f32.mrf.mxu3  ;;  %v2330_v49 = vadd.f32 %v2197_v32, %v1798_v41 }
 0x137   : > { %3500 = vst [vmem:[%s3827_s28 + $0x40] sm:$0xff] %v3374_v43   ;;  %v2018_v27 = vsel %vm1975_vm1, %v2015_v7, %v2017_v38  ;;  %v1052_v46 = vor.u32 %v1050_v18, %v1048_v17 }
 0x138   : > { %3152 = vmatmul.msk.bf16.gmra.mxu0 %vm502_vm0, %v3920_v40  ;;  %v2526_v56 = vadd.f32 %v3808_v37, %v2330_v49 }
 0x13a   : > { %v2654_v40 = vmul.f32 0.2, %v2526_v56  ;;  %vm2590_vm8 = vcmp.gt.f32.partialorder %v2526_v56, 0.0 }
 0x13b   : > { %v1667_v55 = vpop.f32.mrf.mxu2  ;;  %3266 = vmatmul.msk.bf16.gmra.mxu3 %vm502_vm0, %v2014_v50 }
 0x13c   : > { %v1799_v57 = vadd.f32 %v1667_v55, %v1418_v54  ;;  %v1289_v58 = vpop.f32.mrf.mxu1  ;;  %v2718_v3 = vsel %vm2590_vm8, %v2526_v56, %v2654_v40 }
 0x13d   : > { %v660_v60 = vpop.f32.mrf.mxu0  ;;  %v1419_v0 = vadd.f32 %v1289_v58, %v658_v45 }
 0x13e   : > { %v2331_v61 = vadd.f32 %v2199_v47, %v1799_v57  ;;  %v2202_v62 = vpop.f32.mrf.mxu3  ;;  %v1055_v47 = vrot.slane %v1053_v42, 1 }
 0x13f   : > { %3190 = vmatmul.msk.bf16.gmra.mxu1 %vm502_vm0, %v1035_v29 }
 0x140   : > { %v2527_v63 = vadd.f32 %v3808_v37, %v2331_v61  ;;  %3228 = vmatmul.msk.bf16.gmra.mxu2 %vm502_vm0, %v1042_v59  ;;  %v1056_v55 = vsel %vm899_vm2, %v1052_v46, %v1055_v47  ;;  %v4000_v61 = vld [vmem:[%s3727_s14 + $0xb8] sm:$0xff] }
 0x141   : > { %v1060_v7 = vshll.u32 %v4000_v61, 16 }
 0x142   : > { %vm2591_vm9 = vcmp.gt.f32.partialorder %v2527_v63, 0.0  ;;  %v2655_v2 = vmul.f32 0.2, %v2527_v63 }
 0x143   : > { %v1670_v44 = vpop.f32.mrf.mxu2 }
 0x144   : > { %v2719_v4 = vsel %vm2591_vm9, %v2527_v63, %v2655_v2  ;;  %v1800_v6 = vadd.f32 %v1670_v44, %v1419_v0  ;;  %v1291_v48 = vpop.f32.mrf.mxu1 }
 0x145   : > { %v3379_v8 = vpack.c.bf16 %v2719_v4, %v2718_v3  ;;  %v663_v10 = vpop.f32.mrf.mxu0  ;;  %v1420_v19 = vadd.f32 %v1291_v48, %v660_v60  ;;  %v2019_v3 = vrot.slane %v4000_v61, 1  ;;  %v1057_v48 = vshrl.u32 %v3984_v31, 16 }
 0x146   : > { %v2204_v12 = vpop.f32.mrf.mxu3  ;;  %v2332_v15 = vadd.f32 %v2202_v62, %v1800_v6 }
 0x147   : > { %3501 = vst [vmem:[%s3827_s28 + $0x48] sm:$0xff] %v3379_v8   ;;  %v2020_v53 = vsel %vm1975_vm1, %v2017_v38, %v2019_v3  ;;  %v1059_v11 = vor.u32 %v1057_v48, %v1055_v47 }
 0x148   : > { %3153 = vmatmul.msk.bf16.gmra.mxu0 %vm502_vm0, %v3936_v5  ;;  %v2528_v21 = vadd.f32 %v3808_v37, %v2332_v15 }
 0x14a   : > { %v2656_v5 = vmul.f32 0.2, %v2528_v21  ;;  %vm2592_vm10 = vcmp.gt.f32.partialorder %v2528_v21, 0.0 }
 0x14b   : > { %v1672_v20 = vpop.f32.mrf.mxu2  ;;  %3267 = vmatmul.msk.bf16.gmra.mxu3 %vm502_vm0, %v2016_v14 }
 0x14c   : > { %v1801_v22 = vadd.f32 %v1672_v20, %v1420_v19  ;;  %v1294_v23 = vpop.f32.mrf.mxu1  ;;  %v2720_v33 = vsel %vm2592_vm10, %v2528_v21, %v2656_v5 }
 0x14d   : > { %v665_v25 = vpop.f32.mrf.mxu0  ;;  %v1421_v30 = vadd.f32 %v1294_v23, %v663_v10 }
 0x14e   : > { %v2333_v26 = vadd.f32 %v2204_v12, %v1801_v22  ;;  %v2207_v28 = vpop.f32.mrf.mxu3  ;;  %v1062_v12 = vrot.slane %v1060_v7, 1 }
 0x14f   : > { %3191 = vmatmul.msk.bf16.gmra.mxu1 %vm502_vm0, %v1042_v59 }
 0x150   : > { %v2529_v29 = vadd.f32 %v3808_v37, %v2333_v26  ;;  %3229 = vmatmul.msk.bf16.gmra.mxu2 %vm502_vm0, %v1049_v24  ;;  %v1063_v20 = vsel %vm899_vm2, %v1059_v11, %v1062_v12  ;;  %v4016_v26 = vld [vmem:[%s3727_s14 + $0xc0] sm:$0xff] }
 0x151   : > { %v1067_v38 = vshll.u32 %v4016_v26, 16 }
 0x152   : > { %vm2593_vm11 = vcmp.gt.f32.partialorder %v2529_v29, 0.0  ;;  %v2657_v32 = vmul.f32 0.2, %v2529_v29 }
 0x153   : > { %v1675_v9 = vpop.f32.mrf.mxu2 }
 0x154   : > { %v2721_v34 = vsel %vm2593_vm11, %v2529_v29, %v2657_v32  ;;  %v1802_v36 = vadd.f32 %v1675_v9, %v1421_v30  ;;  %v1296_v13 = vpop.f32.mrf.mxu1 }
 0x155   : > { %v3384_v39 = vpack.c.bf16 %v2721_v34, %v2720_v33  ;;  %v668_v41 = vpop.f32.mrf.mxu0  ;;  %v1422_v49 = vadd.f32 %v1296_v13, %v665_v25  ;;  %v2021_v33 = vrot.slane %v4016_v26, 1  ;;  %v1064_v13 = vshrl.u32 %v4000_v61, 16 }
 0x156   : > { %v2209_v43 = vpop.f32.mrf.mxu3  ;;  %v2334_v45 = vadd.f32 %v2207_v28, %v1802_v36 }
 0x157   : > { %3502 = vst [vmem:[%s3827_s28 + $0x50] sm:$0xff] %v3384_v39   ;;  %v2022_v18 = vsel %vm1975_vm1, %v2019_v3, %v2021_v33  ;;  %v1066_v42 = vor.u32 %v1064_v13, %v1062_v12 }
 0x158   : > { %3154 = vmatmul.msk.bf16.gmra.mxu0 %vm502_vm0, %v3952_v35  ;;  %v2530_v51 = vadd.f32 %v3808_v37, %v2334_v45 }
 0x15a   : > { %v2658_v35 = vmul.f32 0.2, %v2530_v51  ;;  %vm2594_vm12 = vcmp.gt.f32.partialorder %v2530_v51, 0.0 }
 0x15b   : > { %v1677_v50 = vpop.f32.mrf.mxu2  ;;  %3268 = vmatmul.msk.bf16.gmra.mxu3 %vm502_vm0, %v2018_v27 }
 0x15c   : > { %v1803_v52 = vadd.f32 %v1677_v50, %v1422_v49  ;;  %v1299_v54 = vpop.f32.mrf.mxu1  ;;  %v2722_v63 = vsel %vm2594_vm12, %v2530_v51, %v2658_v35 }
 0x15d   : > { %v670_v56 = vpop.f32.mrf.mxu0  ;;  %v1423_v60 = vadd.f32 %v1299_v54, %v668_v41 }
 0x15e   : > { %v2335_v57 = vadd.f32 %v2209_v43, %v1803_v52  ;;  %v2212_v58 = vpop.f32.mrf.mxu3  ;;  %v1069_v43 = vrot.slane %v1067_v38, 1 }
 0x15f   : > { %3192 = vmatmul.msk.bf16.gmra.mxu1 %vm502_vm0, %v1049_v24 }
 0x160   : > { %v2531_v59 = vadd.f32 %v3808_v37, %v2335_v57  ;;  %3230 = vmatmul.msk.bf16.gmra.mxu2 %vm502_vm0, %v1056_v55  ;;  %v1070_v50 = vsel %vm899_vm2, %v1066_v42, %v1069_v43  ;;  %v4032_v57 = vld [vmem:[%s3727_s14 + $0xc8] sm:$0xff] }
 0x162   : > { %vm2595_vm13 = vcmp.gt.f32.partialorder %v2531_v59, 0.0  ;;  %v2659_v62 = vmul.f32 0.2, %v2531_v59 }
 0x163   : > { %v1680_v40 = vpop.f32.mrf.mxu2 }
 0x164   : > { %v2723_v0 = vsel %vm2595_vm13, %v2531_v59, %v2659_v62  ;;  %v1804_v2 = vadd.f32 %v1680_v40, %v1423_v60  ;;  %v1301_v44 = vpop.f32.mrf.mxu1 }
 0x165   : > { %v3389_v4 = vpack.c.bf16 %v2723_v0, %v2722_v63  ;;  %v673_v6 = vpop.f32.mrf.mxu0  ;;  %v1424_v15 = vadd.f32 %v1301_v44, %v670_v56  ;;  %v2023_v63 = vrot.slane %v4032_v57, 1  ;;  %v1074_v44 = vshll.u32 %v4032_v57, 16 }
 0x166   : > { %v2214_v8 = vpop.f32.mrf.mxu3  ;;  %v2336_v10 = vadd.f32 %v2212_v58, %v1804_v2 }
 0x167   : > { %3503 = vst [vmem:[%s3827_s28 + $0x58] sm:$0xff] %v3389_v4   ;;  %v1076_v7 = vrot.slane %v1074_v44, 1 }
 0x168   : > { %3155 = vmatmul.msk.bf16.gmra.mxu0 %vm502_vm0, %v3968_v1  ;;  %v2532_v16 = vadd.f32 %v3808_v37, %v2336_v10 }
 0x16a   : > { %v2660_v1 = vmul.f32 0.2, %v2532_v16  ;;  %vm2596_vm14 = vcmp.gt.f32.partialorder %v2532_v16, 0.0 }
 0x16b   : > { %v1682_v14 = vpop.f32.mrf.mxu2  ;;  %3269 = vmatmul.msk.bf16.gmra.mxu3 %vm502_vm0, %v2020_v53  ;;  %v4045_v53 = vld [vmem:[%s4244_s3] ss:$0 sm:$0xff] }
 0x16c   : > { %v1805_v17 = vadd.f32 %v1682_v14, %v1424_v15  ;;  %v1304_v19 = vpop.f32.mrf.mxu1  ;;  %v2724_v29 = vsel %vm2596_vm14, %v2532_v16, %v2660_v1 }
 0x16d   : > { %v675_v21 = vpop.f32.mrf.mxu0  ;;  %v1425_v25 = vadd.f32 %v1304_v19, %v673_v6  ;;  %v2024_v6 = vsel %vm1975_vm1, %v2021_v33, %v2023_v63 }
 0x16e   : > { %v2337_v22 = vadd.f32 %v2214_v8, %v1805_v17  ;;  %v2217_v23 = vpop.f32.mrf.mxu3 }
 0x16f   : > { %3193 = vmatmul.msk.bf16.gmra.mxu1 %vm502_vm0, %v1056_v55 }
 0x170   : > { %v2533_v24 = vadd.f32 %v3808_v37, %v2337_v22  ;;  %3231 = vmatmul.msk.bf16.gmra.mxu2 %vm502_vm0, %v1063_v20  ;;  %v4053_v22 = vld [vmem:[%s3727_s14 + $0xd0] sm:$0xff] }
 0x171   : > { %v1081_v33 = vshll.u32 %v4053_v22, 16 }
 0x172   : > { %vm2597_vm15 = vcmp.gt.f32.partialorder %v2533_v24, 0.0  ;;  %v2661_v28 = vmul.f32 0.2, %v2533_v24 }
 0x173   : > { %v1685_v5 = vpop.f32.mrf.mxu2 }
 0x174   : > { %v2725_v30 = vsel %vm2597_vm15, %v2533_v24, %v2661_v28  ;;  %v1806_v32 = vadd.f32 %v1685_v5, %v1425_v25  ;;  %v1306_v9 = vpop.f32.mrf.mxu1 }
 0x175   : > { %v3394_v34 = vpack.c.bf16 %v2725_v30, %v2724_v29  ;;  %v678_v36 = vpop.f32.mrf.mxu0  ;;  %v1426_v45 = vadd.f32 %v1306_v9, %v675_v21  ;;  %v2025_v29 = vrot.slane %v4053_v22, 1  ;;  %v1078_v9 = vshrl.u32 %v4032_v57, 16 }
 0x176   : > { %v2219_v39 = vpop.f32.mrf.mxu3  ;;  %v2338_v41 = vadd.f32 %v2217_v23, %v1806_v32 }
 0x177   : > { %3504 = vst [vmem:[%s3827_s28 + $0x60] sm:$0xff] %v3394_v34   ;;  %v2026_v13 = vsel %vm1975_vm1, %v2023_v63, %v2025_v29  ;;  %v1080_v38 = vor.u32 %v1078_v9, %v1076_v7 }
 0x178   : > { %3156 = vmatmul.msk.bf16.gmra.mxu0 %vm502_vm0, %v3984_v31  ;;  %v2534_v46 = vadd.f32 %v3808_v37, %v2338_v41 }
 0x17a   : > { %v2662_v31 = vmul.f32 0.2, %v2534_v46  ;;  %vm2598_vm3 = vcmp.gt.f32.partialorder %v2534_v46, 0.0 }
 0x17b   : > { %v1687_v27 = vpop.f32.mrf.mxu2  ;;  %3270 = vmatmul.msk.bf16.gmra.mxu3 %vm502_vm0, %v2022_v18 }
 0x17c   : > { %v1807_v47 = vadd.f32 %v1687_v27, %v1426_v45  ;;  %v1309_v49 = vpop.f32.mrf.mxu1  ;;  %v2726_v59 = vsel %vm2598_vm3, %v2534_v46, %v2662_v31 }
 0x17d   : > { %v680_v51 = vpop.f32.mrf.mxu0  ;;  %v1427_v56 = vadd.f32 %v1309_v49, %v678_v36 }
 0x17e   : > { %v2339_v52 = vadd.f32 %v2219_v39, %v1807_v47  ;;  %v2222_v54 = vpop.f32.mrf.mxu3  ;;  %v1083_v39 = vrot.slane %v1081_v33, 1 }
 0x17f   : > { %3194 = vmatmul.msk.bf16.gmra.mxu1 %vm502_vm0, %v1063_v20 }
 0x180   : > { %v2535_v55 = vadd.f32 %v3808_v37, %v2339_v52  ;;  %3232 = vmatmul.msk.bf16.gmra.mxu2 %vm502_vm0, %v1070_v50  ;;  %v1071_v37 = vshrl.u32 %v4016_v26, 16  ;;  %v1084_v27 = vsel %vm899_vm2, %v1080_v38, %v1083_v39  ;;  %v4069_v52 = vld [vmem:[%s3727_s14 + $0xd8] sm:$0xff] }
 0x181   : > { %v1088_v63 = vshll.u32 %v4069_v52, 16 }
 0x182   : > { %vm2599_vm4 = vcmp.gt.f32.partialorder %v2535_v55, 0.0  ;;  %v2663_v58 = vmul.f32 0.2, %v2535_v55  ;;  %v1073_v48 = vor.u32 %v1071_v37, %v1069_v43 }
 0x183   : > { %v1690_v35 = vpop.f32.mrf.mxu2 }
 0x184   : > { %v2727_v60 = vsel %vm2599_vm4, %v2535_v55, %v2663_v58  ;;  %v1808_v62 = vadd.f32 %v1690_v35, %v1427_v56  ;;  %v1311_v40 = vpop.f32.mrf.mxu1 }
 0x185   : > { %v3399_v0 = vpack.c.bf16 %v2727_v60, %v2726_v59  ;;  %v683_v2 = vpop.f32.mrf.mxu0  ;;  %v1428_v8 = vadd.f32 %v1311_v40, %v680_v51  ;;  %v2027_v59 = vrot.slane %v4069_v52, 1  ;;  %v1085_v40 = vshrl.u32 %v4053_v22, 16 }
 0x186   : > { %v2224_v3 = vpop.f32.mrf.mxu3  ;;  %v2340_v4 = vadd.f32 %v2222_v54, %v1808_v62 }
 0x187   : > { %3505 = vst [vmem:[%s3827_s28 + $0x68] sm:$0xff] %v3399_v0   ;;  %v2028_v37 = vsel %vm1975_vm1, %v2025_v29, %v2027_v59  ;;  %v1087_v44 = vor.u32 %v1085_v40, %v1083_v39 }
 0x188   : > { %3157 = vmatmul.msk.bf16.gmra.mxu0 %vm502_vm0, %v4000_v61  ;;  %v2536_v11 = vadd.f32 %v4045_v53, %v2340_v4  ;;  %v1077_v61 = vsel %vm899_vm2, %v1073_v48, %v1076_v7 }
 0x18a   : > { %v2664_v19 = vmul.f32 0.2, %v2536_v11  ;;  %vm2600_vm5 = vcmp.gt.f32.partialorder %v2536_v11, 0.0 }
 0x18b   : > { %v1692_v10 = vpop.f32.mrf.mxu2  ;;  %3271 = vmatmul.msk.bf16.gmra.mxu3 %vm502_vm0, %v2024_v6 }
 0x18c   : > { %v1809_v12 = vadd.f32 %v1692_v10, %v1428_v8  ;;  %v1314_v15 = vpop.f32.mrf.mxu1  ;;  %v2728_v24 = vsel %vm2600_vm5, %v2536_v11, %v2664_v19 }
 0x18d   : > { %v685_v14 = vpop.f32.mrf.mxu0  ;;  %v1429_v21 = vadd.f32 %v1314_v15, %v683_v2 }
 0x18e   : > { %v2341_v16 = vadd.f32 %v2224_v3, %v1809_v12  ;;  %v2227_v17 = vpop.f32.mrf.mxu3  ;;  %v1090_v3 = vrot.slane %v1088_v63, 1 }
 0x18f   : > { %3195 = vmatmul.msk.bf16.gmra.mxu1 %vm502_vm0, %v1070_v50 }
 0x190   : > { %v2537_v20 = vadd.f32 %v4045_v53, %v2341_v16  ;;  %3233 = vmatmul.msk.bf16.gmra.mxu2 %vm502_vm0, %v1077_v61  ;;  %v1091_v10 = vsel %vm899_vm2, %v1087_v44, %v1090_v3  ;;  %v4085_v16 = vld [vmem:[%s3727_s14 + $0xe0] sm:$0xff] }
 0x191   : > { %v1095_v29 = vshll.u32 %v4085_v16, 16 }
 0x192   : > { %vm2601_vm6 = vcmp.gt.f32.partialorder %v2537_v20, 0.0  ;;  %v2665_v23 = vmul.f32 0.2, %v2537_v20 }
 0x193   : > { %v1695_v1 = vpop.f32.mrf.mxu2 }
 0x194   : > { %v2729_v25 = vsel %vm2601_vm6, %v2537_v20, %v2665_v23  ;;  %v1810_v28 = vadd.f32 %v1695_v1, %v1429_v21  ;;  %v1316_v5 = vpop.f32.mrf.mxu1 }
 0x195   : > { %v3404_v30 = vpack.c.bf16 %v2729_v25, %v2728_v24  ;;  %v688_v32 = vpop.f32.mrf.mxu0  ;;  %v1430_v41 = vadd.f32 %v1316_v5, %v685_v14  ;;  %v2029_v24 = vrot.slane %v4085_v16, 1  ;;  %v1092_v5 = vshrl.u32 %v4069_v52, 16 }
 0x196   : > { %v2229_v34 = vpop.f32.mrf.mxu3  ;;  %v2342_v36 = vadd.f32 %v2227_v17, %v1810_v28 }
 0x197   : > { %3506 = vst [vmem:[%s3827_s28 + $0x70] sm:$0xff] %v3404_v30   ;;  %v2030_v9 = vsel %vm1975_vm1, %v2027_v59, %v2029_v24  ;;  %v1094_v33 = vor.u32 %v1092_v5, %v1090_v3 }
 0x198   : > { %3158 = vmatmul.msk.bf16.gmra.mxu0 %vm502_vm0, %v4016_v26  ;;  %v2538_v42 = vadd.f32 %v4045_v53, %v2342_v36 }
 0x19a   : > { %v2666_v26 = vmul.f32 0.2, %v2538_v42  ;;  %vm2602_vm7 = vcmp.gt.f32.partialorder %v2538_v42, 0.0 }
 0x19b   : > { %v1697_v18 = vpop.f32.mrf.mxu2  ;;  %3272 = vmatmul.msk.bf16.gmra.mxu3 %vm502_vm0, %v2026_v13 }
 0x19c   : > { %v1811_v43 = vadd.f32 %v1697_v18, %v1430_v41  ;;  %v1319_v45 = vpop.f32.mrf.mxu1  ;;  %v2730_v55 = vsel %vm2602_vm7, %v2538_v42, %v2666_v26 }
 0x19d   : > { %v690_v46 = vpop.f32.mrf.mxu0  ;;  %v1431_v51 = vadd.f32 %v1319_v45, %v688_v32 }
 0x19e   : > { %v2343_v47 = vadd.f32 %v2229_v34, %v1811_v43  ;;  %v2232_v49 = vpop.f32.mrf.mxu3  ;;  %v1097_v34 = vrot.slane %v1095_v29, 1 }
 0x19f   : > { %3196 = vmatmul.msk.bf16.gmra.mxu1 %vm502_vm0, %v1077_v61 }
 0x1a0   : > { %v2539_v50 = vadd.f32 %v4045_v53, %v2343_v47  ;;  %3234 = vmatmul.msk.bf16.gmra.mxu2 %vm502_vm0, %v1084_v27  ;;  %v1098_v18 = vsel %vm899_vm2, %v1094_v33, %v1097_v34  ;;  %v4101_v47 = vld [vmem:[%s3727_s14 + $0xe8] sm:$0xff] }
 0x1a1   : > { %v1102_v59 = vshll.u32 %v4101_v47, 16 }
 0x1a2   : > { %vm2603_vm8 = vcmp.gt.f32.partialorder %v2539_v50, 0.0  ;;  %v2667_v54 = vmul.f32 0.2, %v2539_v50 }
 0x1a3   : > { %v1700_v31 = vpop.f32.mrf.mxu2 }
 0x1a4   : > { %v2731_v56 = vsel %vm2603_vm8, %v2539_v50, %v2667_v54  ;;  %v1812_v58 = vadd.f32 %v1700_v31, %v1431_v51  ;;  %v1321_v35 = vpop.f32.mrf.mxu1 }
 0x1a5   : > { %v3409_v60 = vpack.c.bf16 %v2731_v56, %v2730_v55  ;;  %v693_v62 = vpop.f32.mrf.mxu0  ;;  %v1432_v4 = vadd.f32 %v1321_v35, %v690_v46  ;;  %v2031_v55 = vrot.slane %v4101_v47, 1  ;;  %v1099_v35 = vshrl.u32 %v4085_v16, 16 }
 0x1a6   : > { %v2234_v0 = vpop.f32.mrf.mxu3  ;;  %v2344_v2 = vadd.f32 %v2232_v49, %v1812_v58 }
 0x1a7   : > { %3507 = vst [vmem:[%s3827_s28 + $0x78] sm:$0xff] %v3409_v60   ;;  %v2032_v40 = vsel %vm1975_vm1, %v2029_v24, %v2031_v55  ;;  %v1101_v63 = vor.u32 %v1099_v35, %v1097_v34 }
 0x1a8   : > { %3159 = vmatmul.msk.bf16.gmra.mxu0 %vm502_vm0, %v4032_v57  ;;  %v2540_v48 = vadd.f32 %v4045_v53, %v2344_v2 }
 0x1aa   : > { %v2668_v57 = vmul.f32 0.2, %v2540_v48  ;;  %vm2604_vm9 = vcmp.gt.f32.partialorder %v2540_v48, 0.0 }
 0x1ab   : > { %v1702_v6 = vpop.f32.mrf.mxu2  ;;  %3273 = vmatmul.msk.bf16.gmra.mxu3 %vm502_vm0, %v2028_v37 }
 0x1ac   : > { %v1813_v7 = vadd.f32 %v1702_v6, %v1432_v4  ;;  %v1324_v8 = vpop.f32.mrf.mxu1  ;;  %v2732_v20 = vsel %vm2604_vm9, %v2540_v48, %v2668_v57 }
 0x1ad   : > { %v695_v11 = vpop.f32.mrf.mxu0  ;;  %v1433_v14 = vadd.f32 %v1324_v8, %v693_v62 }
 0x1ae   : > { %v2345_v12 = vadd.f32 %v2234_v0, %v1813_v7  ;;  %v2237_v15 = vpop.f32.mrf.mxu3  ;;  %v1104_v0 = vrot.slane %v1102_v59, 1 }
 0x1af   : > { %3197 = vmatmul.msk.bf16.gmra.mxu1 %vm502_vm0, %v1084_v27 }
 0x1b0   : > { %v2541_v61 = vadd.f32 %v4045_v53, %v2345_v12  ;;  %3235 = vmatmul.msk.bf16.gmra.mxu2 %vm502_vm0, %v1091_v10  ;;  %v1105_v6 = vsel %vm899_vm2, %v1101_v63, %v1104_v0  ;;  %v4117_v12 = vld [vmem:[%s3727_s14 + $0xf0] sm:$0xff] }
 0x1b1   : > { %v1109_v24 = vshll.u32 %v4117_v12, 16 }
 0x1b2   : > { %vm2605_vm10 = vcmp.gt.f32.partialorder %v2541_v61, 0.0  ;;  %v2669_v17 = vmul.f32 0.2, %v2541_v61 }
 0x1b3   : > { %v1705_v19 = vpop.f32.mrf.mxu2 }
 0x1b4   : > { %v2733_v21 = vsel %vm2605_vm10, %v2541_v61, %v2669_v17  ;;  %v1814_v23 = vadd.f32 %v1705_v19, %v1433_v14  ;;  %v1326_v1 = vpop.f32.mrf.mxu1 }
 0x1b5   : > { %v3414_v25 = vpack.c.bf16 %v2733_v21, %v2732_v20  ;;  %v698_v28 = vpop.f32.mrf.mxu0  ;;  %v1434_v36 = vadd.f32 %v1326_v1, %v695_v11  ;;  %v2033_v20 = vrot.slane %v4117_v12, 1  ;;  %v1106_v1 = vshrl.u32 %v4101_v47, 16 }
 0x1b6   : > { %v2239_v30 = vpop.f32.mrf.mxu3  ;;  %v2346_v32 = vadd.f32 %v2237_v15, %v1814_v23 }
 0x1b7   : > { %3508 = vst [vmem:[%s3827_s28 + $0x80] sm:$0xff] %v3414_v25   ;;  %v2034_v5 = vsel %vm1975_vm1, %v2031_v55, %v2033_v20  ;;  %v1108_v29 = vor.u32 %v1106_v1, %v1104_v0 }
 0x1b8   : > { %3160 = vmatmul.msk.bf16.gmra.mxu0 %vm502_vm0, %v4053_v22  ;;  %v2542_v38 = vadd.f32 %v4045_v53, %v2346_v32 }
 0x1ba   : > { %v2670_v22 = vmul.f32 0.2, %v2542_v38  ;;  %vm2606_vm11 = vcmp.gt.f32.partialorder %v2542_v38, 0.0 }
 0x1bb   : > { %v1707_v13 = vpop.f32.mrf.mxu2  ;;  %3274 = vmatmul.msk.bf16.gmra.mxu3 %vm502_vm0, %v2030_v9 }
 0x1bc   : > { %v1815_v39 = vadd.f32 %v1707_v13, %v1434_v36  ;;  %v1329_v41 = vpop.f32.mrf.mxu1  ;;  %v2734_v50 = vsel %vm2606_vm11, %v2542_v38, %v2670_v22 }
 0x1bd   : > { %v700_v42 = vpop.f32.mrf.mxu0  ;;  %v1435_v46 = vadd.f32 %v1329_v41, %v698_v28 }
 0x1be   : > { %v2347_v43 = vadd.f32 %v2239_v30, %v1815_v39  ;;  %v2242_v45 = vpop.f32.mrf.mxu3  ;;  %v1111_v30 = vrot.slane %v1109_v24, 1 }
 0x1bf   : > { %3198 = vmatmul.msk.bf16.gmra.mxu1 %vm502_vm0, %v1091_v10 }
 0x1c0   : > { %v2543_v27 = vadd.f32 %v4045_v53, %v2347_v43  ;;  %3236 = vmatmul.msk.bf16.gmra.mxu2 %vm502_vm0, %v1098_v18  ;;  %v1112_v13 = vsel %vm899_vm2, %v1108_v29, %v1111_v30  ;;  %v4134_v43 = vld [vmem:[%s3727_s14 + $0xf8] sm:$0xff] }
 0x1c1   : > { %v1116_v55 = vshll.u32 %v4134_v43, 16 }
 0x1c2   : > { %vm2607_vm12 = vcmp.gt.f32.partialorder %v2543_v27, 0.0  ;;  %v2671_v49 = vmul.f32 0.2, %v2543_v27 }
 0x1c3   : > { %v1710_v26 = vpop.f32.mrf.mxu2 }
 0x1c4   : > { %v2735_v51 = vsel %vm2607_vm12, %v2543_v27, %v2671_v49  ;;  %v1816_v54 = vadd.f32 %v1710_v26, %v1435_v46  ;;  %v1331_v31 = vpop.f32.mrf.mxu1 }
 0x1c5   : > { %v3419_v56 = vpack.c.bf16 %v2735_v51, %v2734_v50  ;;  %v703_v58 = vpop.f32.mrf.mxu0  ;;  %v1436_v2 = vadd.f32 %v1331_v31, %v700_v42  ;;  %v2035_v50 = vrot.slane %v4134_v43, 1  ;;  %v1113_v31 = vshrl.u32 %v4117_v12, 16 }
 0x1c6   : > { %v2244_v60 = vpop.f32.mrf.mxu3  ;;  %v2348_v62 = vadd.f32 %v2242_v45, %v1816_v54 }
 0x1c7   : > { %3509 = vst [vmem:[%s3827_s28 + $0x88] sm:$0xff] %v3419_v56   ;;  %v2036_v35 = vsel %vm1975_vm1, %v2033_v20, %v2035_v50  ;;  %v1115_v59 = vor.u32 %v1113_v31, %v1111_v30 }
 0x1c8   : > { %3161 = vmatmul.msk.bf16.gmra.mxu0 %vm502_vm0, %v4069_v52  ;;  %v2544_v44 = vadd.f32 %v4045_v53, %v2348_v62 }
 0x1ca   : > { %v2672_v52 = vmul.f32 0.2, %v2544_v44  ;;  %vm2608_vm13 = vcmp.gt.f32.partialorder %v2544_v44, 0.0 }
 0x1cb   : > { %v1712_v37 = vpop.f32.mrf.mxu2  ;;  %3275 = vmatmul.msk.bf16.gmra.mxu3 %vm502_vm0, %v2032_v40 }
 0x1cc   : > { %v1817_v3 = vadd.f32 %v1712_v37, %v1436_v2  ;;  %v1334_v4 = vpop.f32.mrf.mxu1  ;;  %v2736_v61 = vsel %vm2608_vm13, %v2544_v44, %v2672_v52 }
 0x1cd   : > { %v705_v48 = vpop.f32.mrf.mxu0  ;;  %v1437_v11 = vadd.f32 %v1334_v4, %v703_v58 }
 0x1ce   : > { %v2349_v7 = vadd.f32 %v2244_v60, %v1817_v3  ;;  %v2247_v8 = vpop.f32.mrf.mxu3  ;;  %v1118_v60 = vrot.slane %v1116_v55, 1 }
 0x1cf   : > { %3199 = vmatmul.msk.bf16.gmra.mxu1 %vm502_vm0, %v1098_v18 }
 0x1d0   : > { %v2545_v10 = vadd.f32 %v4045_v53, %v2349_v7  ;;  %3237 = vmatmul.msk.bf16.gmra.mxu2 %vm502_vm0, %v1105_v6  ;;  %v1119_v37 = vsel %vm899_vm2, %v1115_v59, %v1118_v60  ;;  %v3324_v7 = vld [vmem:[%s4149_s9] sm:$0xff] }
 0x1d1   : > { %v1124_v20 = vshll.u32 %v3324_v7, 16 }
 0x1d2   : > { %vm2609_vm14 = vcmp.gt.f32.partialorder %v2545_v10, 0.0  ;;  %v2673_v15 = vmul.f32 0.2, %v2545_v10 }
 0x1d3   : > { %v1715_v57 = vpop.f32.mrf.mxu2 }
 0x1d4   : > { %v2737_v14 = vsel %vm2609_vm14, %v2545_v10, %v2673_v15  ;;  %v1818_v17 = vadd.f32 %v1715_v57, %v1437_v11  ;;  %v1336_v19 = vpop.f32.mrf.mxu1 }
 0x1d5   : > { %v3424_v21 = vpack.c.bf16 %v2737_v14, %v2736_v61  ;;  %v708_v23 = vpop.f32.mrf.mxu0  ;;  %v1438_v32 = vadd.f32 %v1336_v19, %v705_v48  ;;  %v2037_v61 = vrot.slane %v3324_v7, 1  ;;  %v1120_v19 = vshrl.u32 %v4134_v43, 16 }
 0x1d6   : > { %v2249_v25 = vpop.f32.mrf.mxu3  ;;  %v2350_v28 = vadd.f32 %v2247_v8, %v1818_v17 }
 0x1d7   : > { %3510 = vst [vmem:[%s3827_s28 + $0x90] sm:$0xff] %v3424_v21   ;;  %v2038_v1 = vsel %vm1975_vm1, %v2035_v50, %v2037_v61  ;;  %v1122_v24 = vor.u32 %v1120_v19, %v1118_v60 }
 0x1d8   : > { %3162 = vmatmul.msk.bf16.gmra.mxu0 %vm502_vm0, %v4085_v16  ;;  %v2546_v33 = vadd.f32 %v4045_v53, %v2350_v28 }
 0x1da   : > { %v2674_v16 = vmul.f32 0.2, %v2546_v33  ;;  %vm2610_vm15 = vcmp.gt.f32.partialorder %v2546_v33, 0.0 }
 0x1db   : > { %v1717_v9 = vpop.f32.mrf.mxu2  ;;  %3276 = vmatmul.msk.bf16.gmra.mxu3 %vm502_vm0, %v2034_v5 }
 0x1dc   : > { %v1819_v34 = vadd.f32 %v1717_v9, %v1438_v32  ;;  %v1339_v36 = vpop.f32.mrf.mxu1  ;;  %v2738_v27 = vsel %vm2610_vm15, %v2546_v33, %v2674_v16 }
 0x1dd   : > { %v710_v38 = vpop.f32.mrf.mxu0  ;;  %v1439_v42 = vadd.f32 %v1339_v36, %v708_v23 }
 0x1de   : > { %v2351_v39 = vadd.f32 %v2249_v25, %v1819_v34  ;;  %v2252_v41 = vpop.f32.mrf.mxu3  ;;  %v1126_v25 = vrot.slane %v1124_v20, 1 }
 0x1df   : > { %3200 = vmatmul.msk.bf16.gmra.mxu1 %vm502_vm0, %v1105_v6 }
 0x1e0   : > { %v2547_v18 = vadd.f32 %v4045_v53, %v2351_v39  ;;  %3238 = vmatmul.msk.bf16.gmra.mxu2 %vm502_vm0, %v1112_v13  ;;  %v1127_v9 = vsel %vm899_vm2, %v1122_v24, %v1126_v25  ;;  %v3325_v39 = vld [vmem:[%s4149_s9 + $0x8] sm:$0xff] }
 0x1e1   : > { %v1598_v50 = vshll.u32 %v3325_v39, 16 }
 0x1e2   : > { %vm2611_vm3 = vcmp.gt.f32.partialorder %v2547_v18, 0.0  ;;  %v2675_v45 = vmul.f32 0.2, %v2547_v18 }
 0x1e3   : > { %v1720_v22 = vpop.f32.mrf.mxu2 }
 0x1e4   : > { %v2739_v46 = vsel %vm2611_vm3, %v2547_v18, %v2675_v45  ;;  %v1820_v49 = vadd.f32 %v1720_v22, %v1439_v42  ;;  %v1341_v26 = vpop.f32.mrf.mxu1 }
 0x1e5   : > { %v3429_v51 = vpack.c.bf16 %v2739_v46, %v2738_v27  ;;  %v713_v54 = vpop.f32.mrf.mxu0  ;;  %v1440_v62 = vadd.f32 %v1341_v26, %v710_v38  ;;  %v2039_v27 = vrot.slane %v3325_v39, 1  ;;  %v1594_v26 = vshrl.u32 %v3324_v7, 16 }
 0x1e6   : > { %v2254_v56 = vpop.f32.mrf.mxu3  ;;  %v2352_v58 = vadd.f32 %v2252_v41, %v1820_v49 }
 0x1e7   : > { %3511 = vst [vmem:[%s3827_s28 + $0x98] sm:$0xff] %v3429_v51   ;;  %v2040_v31 = vsel %vm1975_vm1, %v2037_v61, %v2039_v27  ;;  %v1596_v55 = vor.u32 %v1594_v26, %v1126_v25 }
 0x1e8   : > { %3163 = vmatmul.msk.bf16.gmra.mxu0 %vm502_vm0, %v4101_v47  ;;  %v2548_v63 = vadd.f32 %v4045_v53, %v2352_v58 }
 0x1ea   : > { %v2676_v4 = vmul.f32 0.2, %v2548_v63  ;;  %vm2612_vm4 = vcmp.gt.f32.partialorder %v2548_v63, 0.0 }
 0x1eb   : > { %v1722_v40 = vpop.f32.mrf.mxu2  ;;  %3277 = vmatmul.msk.bf16.gmra.mxu3 %vm502_vm0, %v2036_v35 }
 0x1ec   : > { %v1821_v0 = vadd.f32 %v1722_v40, %v1440_v62  ;;  %v1344_v2 = vpop.f32.mrf.mxu1  ;;  %v2740_v10 = vsel %vm2612_vm4, %v2548_v63, %v2676_v4 }
 0x1ed   : > { %v715_v44 = vpop.f32.mrf.mxu0  ;;  %v1441_v48 = vadd.f32 %v1344_v2, %v713_v54 }
 0x1ee   : > { %v2353_v47 = vadd.f32 %v2254_v56, %v1821_v0  ;;  %v2257_v3 = vpop.f32.mrf.mxu3  ;;  %v1600_v56 = vrot.slane %v1598_v50, 1 }
 0x1ef   : > { %3201 = vmatmul.msk.bf16.gmra.mxu1 %vm502_vm0, %v1112_v13 }
 0x1f0   : > { %v2549_v6 = vadd.f32 %v4045_v53, %v2353_v47  ;;  %3239 = vmatmul.msk.bf16.gmra.mxu2 %vm502_vm0, %v1119_v37  ;;  %v1601_v40 = vsel %vm899_vm2, %v1596_v55, %v1600_v56 }
 0x1f2   : > { %vm2613_vm5 = vcmp.gt.f32.partialorder %v2549_v6, 0.0  ;;  %v2677_v8 = vmul.f32 0.2, %v2549_v6 }
 0x1f3   : > { %v1725_v52 = vpop.f32.mrf.mxu2 }
 0x1f4   : > { %v2741_v11 = vsel %vm2613_vm5, %v2549_v6, %v2677_v8  ;;  %v1822_v15 = vadd.f32 %v1725_v52, %v1441_v48  ;;  %v1346_v57 = vpop.f32.mrf.mxu1 }
 0x1f5   : > { %v3434_v14 = vpack.c.bf16 %v2741_v11, %v2740_v10  ;;  %v718_v17 = vpop.f32.mrf.mxu0  ;;  %v1442_v28 = vadd.f32 %v1346_v57, %v715_v44 }
 0x1f6   : > { %v2259_v21 = vpop.f32.mrf.mxu3  ;;  %v2354_v23 = vadd.f32 %v2257_v3, %v1822_v15 }
 0x1f7   : > { %3512 = vst [vmem:[%s3827_s28 + $0xa0] sm:$0xff] %v3434_v14  }
 0x1f8   : > { %3164 = vmatmul.msk.bf16.gmra.mxu0 %vm502_vm0, %v4117_v12  ;;  %v2550_v29 = vadd.f32 %v4045_v53, %v2354_v23 }
 0x1fa   : > { %v2678_v12 = vmul.f32 0.2, %v2550_v29  ;;  %vm2614_vm6 = vcmp.gt.f32.partialorder %v2550_v29, 0.0 }
 0x1fb   : > { %v1727_v5 = vpop.f32.mrf.mxu2  ;;  %3278 = vmatmul.msk.bf16.gmra.mxu3 %vm502_vm0, %v2038_v1 }
 0x1fc   : > { %v1823_v30 = vadd.f32 %v1727_v5, %v1442_v28  ;;  %v1349_v32 = vpop.f32.mrf.mxu1  ;;  %v2742_v18 = vsel %vm2614_vm6, %v2550_v29, %v2678_v12 }
 0x1fd   : > { %v720_v33 = vpop.f32.mrf.mxu0  ;;  %v1443_v38 = vadd.f32 %v1349_v32, %v718_v17 }
 0x1fe   : > { %v2355_v34 = vadd.f32 %v2259_v21, %v1823_v30  ;;  %v2262_v36 = vpop.f32.mrf.mxu3 }
 0x1ff   : > { %3202 = vmatmul.msk.bf16.gmra.mxu1 %vm502_vm0, %v1119_v37 }
 0x200   : > { %v2551_v13 = vadd.f32 %v4045_v53, %v2355_v34  ;;  %3240 = vmatmul.msk.bf16.gmra.mxu2 %vm502_vm0, %v1127_v9 }
 0x202   : > { %vm2615_vm7 = vcmp.gt.f32.partialorder %v2551_v13, 0.0  ;;  %v2679_v41 = vmul.f32 0.2, %v2551_v13 }
 0x203   : > { %v1730_v16 = vpop.f32.mrf.mxu2 }
 0x204   : > { %v2743_v42 = vsel %vm2615_vm7, %v2551_v13, %v2679_v41  ;;  %v1824_v45 = vadd.f32 %v1730_v16, %v1443_v38  ;;  %v1351_v22 = vpop.f32.mrf.mxu1 }
 0x205   : > { %v3439_v46 = vpack.c.bf16 %v2743_v42, %v2742_v18  ;;  %v723_v49 = vpop.f32.mrf.mxu0  ;;  %v1444_v58 = vadd.f32 %v1351_v22, %v720_v33 }
 0x206   : > { %v2264_v51 = vpop.f32.mrf.mxu3  ;;  %v2356_v54 = vadd.f32 %v2262_v36, %v1824_v45 }
 0x207   : > { %3513 = vst [vmem:[%s3827_s28 + $0xa8] sm:$0xff] %v3439_v46  }
 0x208   : > { %3165 = vmatmul.msk.bf16.gmra.mxu0 %vm502_vm0, %v4134_v43  ;;  %v2552_v59 = vadd.f32 %v4045_v53, %v2356_v54 }
 0x20a   : > { %v2680_v43 = vmul.f32 0.2, %v2552_v59  ;;  %vm2616_vm1 = vcmp.gt.f32.partialorder %v2552_v59, 0.0 }
 0x20b   : > { %v1732_v35 = vpop.f32.mrf.mxu2  ;;  %3279 = vmatmul.msk.bf16.gmra.mxu3 %vm502_vm0, %v2040_v31 }
 0x20c   : > { %v1825_v60 = vadd.f32 %v1732_v35, %v1444_v58  ;;  %v1354_v62 = vpop.f32.mrf.mxu1  ;;  %v2744_v4 = vsel %vm2616_vm1, %v2552_v59, %v2680_v43 }
 0x20d   : > { %v725_v63 = vpop.f32.mrf.mxu0  ;;  %v1445_v44 = vadd.f32 %v1354_v62, %v723_v49 }
 0x20e   : > { %v2357_v0 = vadd.f32 %v2264_v51, %v1825_v60  ;;  %v2267_v2 = vpop.f32.mrf.mxu3 }
 0x20f   : > { %3203 = vmatmul.msk.bf16.gmra.mxu1 %vm502_vm0, %v1127_v9 }
 0x210   : > { %v2553_v37 = vadd.f32 %v4045_v53, %v2357_v0  ;;  %3241 = vmatmul.msk.bf16.gmra.mxu2 %vm502_vm0, %v1601_v40 }
 0x212   : > { %vm2617_vm8 = vcmp.gt.f32.partialorder %v2553_v37, 0.0  ;;  %v2681_v47 = vmul.f32 0.2, %v2553_v37 }
 0x213   : > { %v1735_v3 = vpop.f32.mrf.mxu2 }
 0x214   : > { %v2745_v6 = vsel %vm2617_vm8, %v2553_v37, %v2681_v47  ;;  %v1826_v48 = vadd.f32 %v1735_v3, %v1445_v44  ;;  %v1356_v7 = vpop.f32.mrf.mxu1 }
 0x215   : > { %v3444_v8 = vpack.c.bf16 %v2745_v6, %v2744_v4  ;;  %v728_v52 = vpop.f32.mrf.mxu0  ;;  %v1446_v15 = vadd.f32 %v1356_v7, %v725_v63 }
 0x216   : > { %v2269_v10 = vpop.f32.mrf.mxu3  ;;  %v2358_v11 = vadd.f32 %v2267_v2, %v1826_v48 }
 0x217   : > { %3514 = vst [vmem:[%s3827_s28 + $0xb0] sm:$0xff] %v3444_v8  }
 0x218   : > { %v2554_v61 = vadd.f32 %v4045_v53, %v2358_v11 }
 0x21a   : > { %v2682_v23 = vmul.f32 0.2, %v2554_v61  ;;  %vm2618_vm0 = vcmp.gt.f32.partialorder %v2554_v61, 0.0 }
 0x21b   : > { %v1737_v57 = vpop.f32.mrf.mxu2 }
 0x21c   : > { %v1827_v14 = vadd.f32 %v1737_v57, %v1446_v15  ;;  %v1359_v17 = vpop.f32.mrf.mxu1  ;;  %v2746_v5 = vsel %vm2618_vm0, %v2554_v61, %v2682_v23 }
 0x21d   : > { %v730_v19 = vpop.f32.mrf.mxu0  ;;  %v1447_v24 = vadd.f32 %v1359_v17, %v728_v52 }
 0x21e   : > { %v2359_v20 = vadd.f32 %v2269_v10, %v1827_v14  ;;  %v2272_v21 = vpop.f32.mrf.mxu3 }
 0x220   : > { %v2555_v1 = vadd.f32 %v4045_v53, %v2359_v20 }
 0x222   : > { %vm2619_vm2 = vcmp.gt.f32.partialorder %v2555_v1, 0.0  ;;  %v2683_v25 = vmul.f32 0.2, %v2555_v1 }
 0x223   : > { %v1740_v28 = vpop.f32.mrf.mxu2 }
 0x224   : > { %v2747_v29 = vsel %vm2619_vm2, %v2555_v1, %v2683_v25  ;;  %v1828_v30 = vadd.f32 %v1740_v28, %v1447_v24  ;;  %v1361_v32 = vpop.f32.mrf.mxu1 }
 0x225   : > { %v3449_v9 = vpack.c.bf16 %v2747_v29, %v2746_v5  ;;  %v733_v33 = vpop.f32.mrf.mxu0  ;;  %v1448_v12 = vadd.f32 %v1361_v32, %v730_v19 }
 0x226   : > { %v2274_v34 = vpop.f32.mrf.mxu3  ;;  %v2360_v36 = vadd.f32 %v2272_v21, %v1828_v30 }
 0x227   : > { %3515 = vst [vmem:[%s3827_s28 + $0xb8] sm:$0xff] %v3449_v9  }
 0x228   : > { %v2556_v38 = vadd.f32 %v4045_v53, %v2360_v36 }
 0x22a   : > { %v2684_v45 = vmul.f32 0.2, %v2556_v38  ;;  %vm2620_vm9 = vcmp.gt.f32.partialorder %v2556_v38, 0.0 }
 0x22b   : > { %v1742_v13 = vpop.f32.mrf.mxu2 }
 0x22c   : > { %v1829_v39 = vadd.f32 %v1742_v13, %v1448_v12  ;;  %v1364_v41 = vpop.f32.mrf.mxu1  ;;  %v2748_v26 = vsel %vm2620_vm9, %v2556_v38, %v2684_v45 }
 0x22d   : > { %v735_v16 = vpop.f32.mrf.mxu0  ;;  %v1449_v27 = vadd.f32 %v1364_v41, %v733_v33 }
 0x22e   : > { %v2361_v18 = vadd.f32 %v2274_v34, %v1829_v39  ;;  %v2277_v42 = vpop.f32.mrf.mxu3 }
 0x230   : > { %v2557_v22 = vadd.f32 %v4045_v53, %v2361_v18 }
 0x232   : > { %vm2621_vm10 = vcmp.gt.f32.partialorder %v2557_v22, 0.0  ;;  %v2685_v46 = vmul.f32 0.2, %v2557_v22 }
 0x233   : > { %v1745_v49 = vpop.f32.mrf.mxu2 }
 0x234   : > { %v2749_v50 = vsel %vm2621_vm10, %v2557_v22, %v2685_v46  ;;  %v1830_v51 = vadd.f32 %v1745_v49, %v1449_v27  ;;  %v1366_v54 = vpop.f32.mrf.mxu1 }
 0x235   : > { %v3454_v31 = vpack.c.bf16 %v2749_v50, %v2748_v26  ;;  %v738_v55 = vpop.f32.mrf.mxu0  ;;  %v1450_v35 = vadd.f32 %v1366_v54, %v735_v16 }
 0x236   : > { %v2279_v56 = vpop.f32.mrf.mxu3  ;;  %v2362_v58 = vadd.f32 %v2277_v42, %v1830_v51 }
 0x237   : > { %3516 = vst [vmem:[%s3827_s28 + $0xc0] sm:$0xff] %v3454_v31  }
 0x238   : > { %v2558_v60 = vadd.f32 %v4045_v53, %v2362_v58 }
 0x23a   : > { %v2686_v43 = vmul.f32 0.2, %v2558_v60  ;;  %vm2622_vm11 = vcmp.gt.f32.partialorder %v2558_v60, 0.0 }
 0x23b   : > { %v1747_v59 = vpop.f32.mrf.mxu2 }
 0x23c   : > { %v1831_v62 = vadd.f32 %v1747_v59, %v1450_v35  ;;  %v1369_v40 = vpop.f32.mrf.mxu1  ;;  %v2750_v4 = vsel %vm2622_vm11, %v2558_v60, %v2686_v43 }
 0x23d   : > { %v740_v63 = vpop.f32.mrf.mxu0  ;;  %v1451_v44 = vadd.f32 %v1369_v40, %v738_v55 }
 0x23e   : > { %v2363_v0 = vadd.f32 %v2279_v56, %v1831_v62  ;;  %v2282_v2 = vpop.f32.mrf.mxu3 }
 0x240   : > { %v2559_v37 = vadd.f32 %v4045_v53, %v2363_v0 }
 0x242   : > { %vm2623_vm12 = vcmp.gt.f32.partialorder %v2559_v37, 0.0  ;;  %v2687_v47 = vmul.f32 0.2, %v2559_v37 }
 0x243   : > { %v1750_v3 = vpop.f32.mrf.mxu2 }
 0x244   : > { %v2751_v6 = vsel %vm2623_vm12, %v2559_v37, %v2687_v47  ;;  %v1832_v48 = vadd.f32 %v1750_v3, %v1451_v44  ;;  %v1371_v7 = vpop.f32.mrf.mxu1 }
 0x245   : > { %v3459_v8 = vpack.c.bf16 %v2751_v6, %v2750_v4  ;;  %v743_v52 = vpop.f32.mrf.mxu0  ;;  %v1452_v15 = vadd.f32 %v1371_v7, %v740_v63 }
 0x246   : > { %v2284_v10 = vpop.f32.mrf.mxu3  ;;  %v2364_v11 = vadd.f32 %v2282_v2, %v1832_v48 }
 0x247   : > { %3517 = vst [vmem:[%s3827_s28 + $0xc8] sm:$0xff] %v3459_v8  }
 0x248   : > { %v2560_v61 = vadd.f32 %v4045_v53, %v2364_v11 }
 0x24a   : > { %v2688_v23 = vmul.f32 0.2, %v2560_v61  ;;  %vm2624_vm13 = vcmp.gt.f32.partialorder %v2560_v61, 0.0 }
 0x24b   : > { %v1752_v57 = vpop.f32.mrf.mxu2 }
 0x24c   : > { %v1833_v14 = vadd.f32 %v1752_v57, %v1452_v15  ;;  %v1374_v17 = vpop.f32.mrf.mxu1  ;;  %v2752_v5 = vsel %vm2624_vm13, %v2560_v61, %v2688_v23 }
 0x24d   : > { %v745_v19 = vpop.f32.mrf.mxu0  ;;  %v1453_v24 = vadd.f32 %v1374_v17, %v743_v52 }
 0x24e   : > { %v2365_v20 = vadd.f32 %v2284_v10, %v1833_v14  ;;  %v2287_v21 = vpop.f32.mrf.mxu3 }
 0x250   : > { %v2561_v1 = vadd.f32 %v4045_v53, %v2365_v20 }
 0x252   : > { %vm2625_vm14 = vcmp.gt.f32.partialorder %v2561_v1, 0.0  ;;  %v2689_v25 = vmul.f32 0.2, %v2561_v1 }
 0x253   : > { %v1755_v28 = vpop.f32.mrf.mxu2 }
 0x254   : > { %v2753_v29 = vsel %vm2625_vm14, %v2561_v1, %v2689_v25  ;;  %v1834_v30 = vadd.f32 %v1755_v28, %v1453_v24  ;;  %v1376_v32 = vpop.f32.mrf.mxu1 }
 0x255   : > { %v3464_v9 = vpack.c.bf16 %v2753_v29, %v2752_v5  ;;  %v748_v33 = vpop.f32.mrf.mxu0  ;;  %v1454_v12 = vadd.f32 %v1376_v32, %v745_v19 }
 0x256   : > { %v2289_v34 = vpop.f32.mrf.mxu3  ;;  %v2366_v36 = vadd.f32 %v2287_v21, %v1834_v30 }
 0x257   : > { %3518 = vst [vmem:[%s3827_s28 + $0xd0] sm:$0xff] %v3464_v9  }
 0x258   : > { %v2562_v38 = vadd.f32 %v4045_v53, %v2366_v36 }
 0x25a   : > { %v2690_v45 = vmul.f32 0.2, %v2562_v38  ;;  %vm2626_vm15 = vcmp.gt.f32.partialorder %v2562_v38, 0.0 }
 0x25b   : > { %v1757_v13 = vpop.f32.mrf.mxu2 }
 0x25c   : > { %v1835_v39 = vadd.f32 %v1757_v13, %v1454_v12  ;;  %v1379_v41 = vpop.f32.mrf.mxu1  ;;  %v2754_v26 = vsel %vm2626_vm15, %v2562_v38, %v2690_v45 }
 0x25d   : > { %v750_v16 = vpop.f32.mrf.mxu0  ;;  %v1455_v27 = vadd.f32 %v1379_v41, %v748_v33 }
 0x25e   : > { %v2367_v18 = vadd.f32 %v2289_v34, %v1835_v39  ;;  %v2292_v42 = vpop.f32.mrf.mxu3 }
 0x260   : > { %v2563_v22 = vadd.f32 %v4045_v53, %v2367_v18 }
 0x262   : > { %vm2627_vm3 = vcmp.gt.f32.partialorder %v2563_v22, 0.0  ;;  %v2691_v46 = vmul.f32 0.2, %v2563_v22 }
 0x263   : > { %v1760_v49 = vpop.f32.mrf.mxu2 }
 0x264   : > { %v2755_v50 = vsel %vm2627_vm3, %v2563_v22, %v2691_v46  ;;  %v1836_v51 = vadd.f32 %v1760_v49, %v1455_v27  ;;  %v1381_v54 = vpop.f32.mrf.mxu1 }
 0x265   : > { %v3469_v31 = vpack.c.bf16 %v2755_v50, %v2754_v26  ;;  %v753_v56 = vpop.f32.mrf.mxu0  ;;  %v1456_v35 = vadd.f32 %v1381_v54, %v750_v16 }
 0x266   : > { %v2294_v55 = vpop.f32.mrf.mxu3  ;;  %v2368_v58 = vadd.f32 %v2292_v42, %v1836_v51 }
 0x267   : > { %3519 = vst [vmem:[%s3827_s28 + $0xd8] sm:$0xff] %v3469_v31  }
 0x268   : > { %v2564_v60 = vadd.f32 %v4045_v53, %v2368_v58 }
 0x26a   : > { %v2692_v2 = vmul.f32 0.2, %v2564_v60  ;;  %vm2628_vm4 = vcmp.gt.f32.partialorder %v2564_v60, 0.0 }
 0x26b   : > { %v1762_v59 = vpop.f32.mrf.mxu2 }
 0x26c   : > { %v1837_v62 = vadd.f32 %v1762_v59, %v1456_v35  ;;  %v1384_v40 = vpop.f32.mrf.mxu1  ;;  %v2756_v4 = vsel %vm2628_vm4, %v2564_v60, %v2692_v2 }
 0x26d   : > { %v1457_v37 = vadd.f32 %v1384_v40, %v753_v56  ;;  %v755_v44 = vpop.f32.mrf.mxu0 }
 0x26e   : > { %v2369_v63 = vadd.f32 %v2294_v55, %v1837_v62  ;;  %v2297_v0 = vpop.f32.mrf.mxu3 }
 0x270   : > { %v2565_v43 = vadd.f32 %v4045_v53, %v2369_v63  ;;  %v3567_v63 = vld [vmem:[%s4244_s3] ss:$0 sm:$0xff] }
 0x272   : > { %vm2629_vm5 = vcmp.gt.f32.partialorder %v2565_v43, 0.0  ;;  %v2693_v47 = vmul.f32 0.2, %v2565_v43 }
 0x273   : > { %v1765_v3 = vpop.f32.mrf.mxu2 }
 0x274   : > { %v2757_v6 = vsel %vm2629_vm5, %v2565_v43, %v2693_v47  ;;  %v1838_v48 = vadd.f32 %v1765_v3, %v1457_v37  ;;  %v1386_v7 = vpop.f32.mrf.mxu1 }
 0x275   : > { %v3474_v8 = vpack.c.bf16 %v2757_v6, %v2756_v4  ;;  %v1458_v11 = vadd.f32 %v1386_v7, %v755_v44  ;;  %v758_v15 = vpop.f32.mrf.mxu0 }
 0x276   : > { %v2299_v52 = vpop.f32.mrf.mxu3  ;;  %v2370_v10 = vadd.f32 %v2297_v0, %v1838_v48 }
 0x277   : > { %3520 = vst [vmem:[%s3827_s28 + $0xe0] sm:$0xff] %v3474_v8  }
 0x278   : > { %v2566_v61 = vadd.f32 %v4045_v53, %v2370_v10 }
 0x27a   : > { %v2694_v21 = vmul.f32 0.2, %v2566_v61  ;;  %vm2630_vm6 = vcmp.gt.f32.partialorder %v2566_v61, 0.0 }
 0x27b   : > { %v1767_v57 = vpop.f32.mrf.mxu2 }
 0x27c   : > { %v1839_v14 = vadd.f32 %v1767_v57, %v1458_v11  ;;  %v1389_v17 = vpop.f32.mrf.mxu1  ;;  %v2758_v28 = vsel %vm2630_vm6, %v2566_v61, %v2694_v21 }
 0x27d   : > { %v1459_v1 = vadd.f32 %v1389_v17, %v758_v15  ;;  %v760_v9 = vpop.f32.mrf.mxu0 }
 0x27e   : > { %v2371_v19 = vadd.f32 %v2299_v52, %v1839_v14  ;;  %v2302_v20 = vpop.f32.mrf.mxu3 }
 0x280   : > { %v2567_v23 = vadd.f32 %v4045_v53, %v2371_v19 }
 0x282   : > { %vm2631_vm7 = vcmp.gt.f32.partialorder %v2567_v23, 0.0  ;;  %v2695_v24 = vmul.f32 0.2, %v2567_v23 }
 0x283   : > { %v1770_v25 = vpop.f32.mrf.mxu2 }
 0x284   : > { %v2759_v5 = vsel %vm2631_vm7, %v2567_v23, %v2695_v24  ;;  %v1840_v29 = vadd.f32 %v1770_v25, %v1459_v1  ;;  %v1391_v30 = vpop.f32.mrf.mxu1 }
 0x285   : > { %v3479_v32 = vpack.c.bf16 %v2759_v5, %v2758_v28  ;;  %v1460_v36 = vadd.f32 %v1391_v30, %v760_v9  ;;  %v763_v16 = vpop.f32.mrf.mxu0 }
 0x286   : > { %v2372_v33 = vadd.f32 %v2302_v20, %v1840_v29  ;;  %v2304_v34 = vpop.f32.mrf.mxu3 }
 0x287   : > { %3521 = vst [vmem:[%s3827_s28 + $0xe8] sm:$0xff] %v3479_v32  }
 0x288   : > { %v2568_v13 = vadd.f32 %v4045_v53, %v2372_v33 }
 0x28a   : > { %v2696_v18 = vmul.f32 0.2, %v2568_v13  ;;  %vm2632_vm1 = vcmp.gt.f32.partialorder %v2568_v13, 0.0 }
 0x28b   : > { %v1772_v12 = vpop.f32.mrf.mxu2 }
 0x28c   : > { %v1841_v38 = vadd.f32 %v1772_v12, %v1460_v36  ;;  %v1394_v39 = vpop.f32.mrf.mxu1  ;;  %v2760_v49 = vsel %vm2632_vm1, %v2568_v13, %v2696_v18 }
 0x28d   : > { %v1461_v45 = vadd.f32 %v1394_v39, %v763_v16  ;;  %v765_v55 = vpop.f32.mrf.mxu0 }
 0x28e   : > { %v2373_v41 = vadd.f32 %v2304_v34, %v1841_v38  ;;  %v2307_v27 = vpop.f32.mrf.mxu3 }
 0x290   : > { %v2569_v42 = vadd.f32 %v4045_v53, %v2373_v41 }
 0x292   : > { %vm2633_vm8 = vcmp.gt.f32.partialorder %v2569_v42, 0.0  ;;  %v2697_v22 = vmul.f32 0.2, %v2569_v42 }
 0x293   : > { %v1775_v46 = vpop.f32.mrf.mxu2 }
 0x294   : > { %v2761_v26 = vsel %vm2633_vm8, %v2569_v42, %v2697_v22  ;;  %v1842_v50 = vadd.f32 %v1775_v46, %v1461_v45  ;;  %v1396_v54 = vpop.f32.mrf.mxu1 }
 0x295   : > { %v3484_v51 = vpack.c.bf16 %v2761_v26, %v2760_v49  ;;  %v1462_v56 = vadd.f32 %v1396_v54, %v765_v55 }
 0x296   : > { %v2374_v31 = vadd.f32 %v2307_v27, %v1842_v50  ;;  %v2309_v60 = vpop.f32.mrf.mxu3 }
 0x297   : > { %3522 = vst [vmem:[%s3827_s28 + $0xf0] sm:$0xff] %v3484_v51  }
 0x298   : > { %v2570_v35 = vadd.f32 %v4045_v53, %v2374_v31 }
 0x29a   : > { %v2698_v40 = vmul.f32 0.2, %v2570_v35  ;;  %vm2634_vm0 = vcmp.gt.f32.partialorder %v2570_v35, 0.0 }
 0x29b   : > { %v1777_v58 = vpop.f32.mrf.mxu2 }
 0x29c   : > { %v1843_v59 = vadd.f32 %v1777_v58, %v1462_v56  ;;  %v2762_v2 = vsel %vm2634_vm0, %v2570_v35, %v2698_v40 }
 0x29e   : > { %v2375_v62 = vadd.f32 %v2309_v60, %v1843_v59 }
 0x2a0   : > { %v2571_v0 = vadd.f32 %v3567_v63, %v2375_v62 }
 0x2a2   : > { %vm2635_vm2 = vcmp.gt.f32.partialorder %v2571_v0, 0.0  ;;  %v2699_v53 = vmul.f32 0.2, %v2571_v0 }
 0x2a4   : > { %v2763_v43 = vsel %vm2635_vm2, %v2571_v0, %v2699_v53 }
 0x2a5   : > { %v3489_v37 = vpack.c.bf16 %v2763_v43, %v2762_v2 }
 0x2a7   : > { %3523 = vst [vmem:[%s3827_s28 + $0xf8] sm:$0xff] %v3489_v37  }
 0x2a8   : > { %3595 = shalt.err (!%p3592_p4)
}
 0x2a9   : > { %s3632_s23 = smov 64   ;;  %s3633_s28 = smov 4  }
 0x2aa   : > { %3524 = dma.vmem_to_hbm [thread:$0]  (%p3697_p5), %s2906_s19, 4096, %s2908_s22, %s2893_s27, %s3632_s23, %s3632_s23, %s3633_s28  }
 0x2ab PF: > { %p3530_p7 = scmp.ge.s32.totalorder %s3630_s18, 2  ;;  %s2922_s10 = sand.u32 1, %s3618_s15  }
 0x2ac   : > { %s2923_s11 = scalar_lea.sflag [#allocation4], %s2922_s10 }
 0x2ad   : > { %p3527_p8 = pnand %p3530_p7, %p3701_p6 }
 0x2af   : > { %p3528_p9 = pneg %p3527_p8 }
 0x2b1   : > { %3613 = dma.done.wait (%p3528_p9), %s2923_s11, 4096  }
 0x2b2   : > { %3615 = vsyncadd (%p3528_p9), %s2923_s11, 4294963200  ;;  %p14_p10 = scmp.ge.s32.totalorder %s3684_s21, 4   ;;  %s4248_s15 = smov %s3622_s16 }
 0x2b3   : > { %s4249_s16 = smov %s3626_s17  ;;  %s4250_s17 = smov %s3695_s24 }
 0x2b4   : > { %s4251_s18 = smov %s3684_s21  ;;  %16 = sbr.rel (!%p14_p10) target bundleno = 3 (0x3), region = 77 }
 0x2b9   :  { %2929 = vsyncpa [#allocation4], 1 }
 0x2ba   :  { %2931 = vsyncpa [#allocation4 + $0x1], 1 }

</bundles_post_ra>
